<compile_context>
chip_gen: v5e
topology: v5e:2x2
jax: 0.10.0
libtpu: 0.0.40
codegen_flags: <defaults>
</compile_context>

<pallas_src>
import numpy as np
import jax
import jax.numpy as jnp
from jax import lax
from jax.experimental import pallas as pl
from jax.experimental.pallas import tpu as pltpu

LANE = 128
SUBLANE = 8

# Conservative per-step tile budget: v7x has only 64 MiB physical VMEM per TensorCore
# (v5e/v6e have 128 MiB).  vmem_limit_bytes is then derived from the ACTUAL estimate.
VMEM_TILE_BUDGET = 24 * 1024 * 1024


def cv2_gaussian_kernel_1d(ksize: int, sigma: float) -> np.ndarray:
    """Reproduces cv2.getGaussianKernel(ksize, sigma); returns shape (ksize,) float64."""
    if sigma <= 0:
        sigma = 0.3 * ((ksize - 1) * 0.5 - 1) + 0.8
    x = np.arange(ksize, dtype=np.float64) - (ksize - 1) * 0.5
    g = np.exp(-(x * x) / (2.0 * sigma * sigma))
    return g / g.sum()


def _round_up(x: int, m: int) -> int:
    return (x + m - 1) // m * m


def _cdiv(a: int, b: int) -> int:
    return -(-a // b)


def _pick_tiles(H, W, pad, L, itemsize, tile_h=None):
    """Choose (TH rows, LB lanes) per grid step from a per-chip VMEM budget."""
    Wp = _round_up(W + 2 * pad, SUBLANE)

    def step_bytes(TH, LB):
        b_in = 2 * TH * Wp * LB * itemsize               # double-buffered input blocks
        b_out = 2 * TH * W * LB * itemsize               # double-buffered output blocks
        # VMEM scratch, worst case (non-separable path): xrows + col + acc (all f32)
        b_scr = ((TH + 2 * pad) * (Wp + W) + TH * W) * LB * 4
        b_tmp = 2 * TH * W * LB * 4                      # traced f32 temporaries
        return b_in + b_out + b_scr + b_tmp

    cands = [lb for lb in (512, 256, 128) if L % lb == 0]
    LB = cands[-1]                                       # 128 always divides L
    for lb in cands:                                     # biggest lane block that fits
        if step_bytes(SUBLANE, lb) <= VMEM_TILE_BUDGET:
            LB = lb
            break

    if tile_h is not None:
        TH = _round_up(max(tile_h, 2 * pad, SUBLANE), SUBLANE)
    else:
        TH = SUBLANE
        cap = min(512, _round_up(H + pad, SUBLANE))      # big tiles amortize ~0.35us/step
        while TH < cap and step_bytes(TH + SUBLANE, LB) <= VMEM_TILE_BUDGET:
            TH += SUBLANE
    TH = max(TH, 2 * pad, SUBLANE)                       # carry copy requires TH >= 2*pad
    nH = _cdiv(H + pad, TH)
    return TH, nH, LB, Wp, step_bytes(TH, LB)


def _to_lane_major(x, pad, Hp, Wp, L):
    """NCHW -> zero-padded (Hp, Wp, L) lane-major stack (single fused transpose+pad).

    rows  [0, H)        : image rows;  [H, Hp)  : zeros (bottom 'same' pad + tile pad)
    cols  [pad, pad+W)  : image cols;  elsewhere: zeros (left/right 'same' pad + sublane pad)
    lanes [0, N*C)      : images;      [N*C, L) : zeros (lane pad to a multiple of 128)

    Lane padding wastes HBM when N*C << 128 (tiny test shapes) but gives unmasked
    lane-dense stores and vanishes at production batch*channels.
    """
    N, C, H, W = x.shape
    NC = N * C
    xt = jnp.transpose(x, (2, 3, 0, 1)).reshape(H, W, NC)
    return jnp.pad(xt, ((0, Hp - H), (pad, Wp - W - pad), (0, L - NC)))


def _make_separable_kernel(taps, TH, W, pad):
    """Separable depthwise blur; taps are compile-time float constants (len K = 2*pad+1)."""
    K = len(taps)

    def kernel(x_ref, o_ref, hblur_ref):
        # x_ref     : (TH, Wp, LB)       raw rows [h*TH, h*TH+TH), zero-padded in W
        # o_ref     : (TH, W,  LB)       output rows [h*TH - pad, h*TH + TH - pad)
        # hblur_ref : (TH+2*pad, W, LB)  f32; rows [0, 2*pad) = carry from previous tile,
        #                                rows [2*pad, 2*pad+TH) = H-blur of this tile.
        h = pl.program_id(1)

        @pl.when(h == 0)
        def _init_carry():
            # 'same' zero padding above the image (its horizontal blur is also zero);
            # only the 2*pad halo rows are touched — never the whole scratch.
            hblur_ref[0:2 * pad, :, :] = jnp.zeros(
                (2 * pad,) + tuple(hblur_ref.shape[1:]), jnp.float32)

        # Horizontal (W) pass over the TH fresh rows only: K sublane-offset slices.
        # (Carried rows were already blurred in the previous step, so nothing is redone.)
        acc_h = taps[0] * x_ref[:, 0:W, :].astype(jnp.float32)
        for kj in range(1, K):
            acc_h = acc_h + taps[kj] * x_ref[:, kj:kj + W, :].astype(jnp.float32)
        hblur_ref[2 * pad:2 * pad + TH, :, :] = acc_h

        # Vertical (H) pass: K major-axis slices (pure addressing), one full-width store.
        acc = taps[0] * hblur_ref[0:TH, :, :]
        for ki in range(1, K):
            acc = acc + taps[ki] * hblur_ref[ki:ki + TH, :, :]
        o_ref[...] = acc.astype(o_ref.dtype)

        # Carry the last 2*pad H-blurred rows into the next tile's top halo.
        hblur_ref[0:2 * pad, :, :] = hblur_ref[TH:TH + 2 * pad, :, :]

    return kernel


def _make_full_kernel(K, TH, W, pad):
    """General (non-separable) KxK depthwise kernel; weights read from SMEM."""

    def kernel(w_ref, x_ref, o_ref, xrows_ref, col_ref, acc_ref):
        # w_ref     : (K, K) f32 in SMEM
        # xrows_ref : (TH+2*pad, Wp, LB) f32; rows [0, 2*pad) = raw-row carry, rest = tile
        # col_ref   : (TH+2*pad, W, LB)  f32; one sublane-shifted column slab
        # acc_ref   : (TH, W, LB)        f32 accumulator
        h = pl.program_id(1)

        @pl.when(h == 0)
        def _init_carry():
            xrows_ref[0:2 * pad, :, :] = jnp.zeros(
                (2 * pad,) + tuple(xrows_ref.shape[1:]), jnp.float32)

        xrows_ref[2 * pad:2 * pad + TH, :, :] = x_ref[...].astype(jnp.float32)

        # Loop-interchanged: ONE sublane-misaligned slice per kj (K total, not K*K);
        # the inner ki taps are major-axis slices of col_ref (free addressing).
        for kj in range(K):
            col_ref[...] = xrows_ref[:, kj:kj + W, :]
            part = w_ref[0, kj] * col_ref[0:TH, :, :]
            for ki in range(1, K):
                part = part + w_ref[ki, kj] * col_ref[ki:ki + TH, :, :]
            if kj == 0:
                acc_ref[...] = part
            else:
                acc_ref[...] = acc_ref[...] + part
        o_ref[...] = acc_ref[...].astype(o_ref.dtype)

        # Carry the last 2*pad raw rows into the next tile's top halo.
        xrows_ref[0:2 * pad, :, :] = xrows_ref[TH:TH + 2 * pad, :, :]

    return kernel


def _blur_call(x, kernel_factory, scratch_factory, extra_inputs, extra_specs,
               K, flops_per_px, tile_h=None):
    assert K % 2 == 1, "GaussianConvBlur translation assumes odd kernel size (pad = K//2)"
    N, C, H, W = x.shape
    pad = K // 2
    NC = N * C
    L = _round_up(NC, LANE)
    itemsize = x.dtype.itemsize

    TH, nH, LB, Wp, est_bytes = _pick_tiles(H, W, pad, L, itemsize, tile_h)
    Hp = nH * TH                            # padded row count; >= H + pad by construction
    nL = L // LB

    xt = _to_lane_major(x, pad, Hp, Wp, L)

    vmem_limit = min(max(int(est_bytes * 1.5) + (4 << 20), 32 << 20), 64 << 20)
    cost = pl.CostEstimate(flops=int(flops_per_px) * H * W * NC,
                           transcendentals=0,
                           bytes_accessed=2 * H * W * NC * itemsize)

    out = pl.pallas_call(
        kernel_factory(TH),
        out_shape=jax.ShapeDtypeStruct((Hp, W, L), x.dtype),
        grid=(nL, nH),                      # lane blocks outer, row tiles inner (carry)
        in_specs=list(extra_specs) + [
            pl.BlockSpec((TH, Wp, LB), lambda l, h: (h, 0, l))],
        out_specs=pl.BlockSpec((TH, W, LB), lambda l, h: (h, 0, l)),
        scratch_shapes=scratch_factory(TH, LB),
        compiler_params=pltpu.CompilerParams(
            # Lane-block axis is megacore-splittable; the row axis carries halo state
            # across steps so it must stay sequential ("arbitrary").
            dimension_semantics=("parallel", "arbitrary"),
            vmem_limit_bytes=int(vmem_limit)),
        cost_estimate=cost,
    )(*extra_inputs, xt)

    # Undo the pad-row output shift, the lane padding and the lane-major layout.
    o = out[pad:pad + H, :, :NC].reshape(H, W, N, C)
    return jnp.transpose(o, (2, 3, 0, 1))


def blur_separable(x, g, tile_h=None):
    """Depthwise Gaussian blur with separable 1-D taps g (numpy, shape (K,))."""
    g = np.asarray(g).reshape(-1)
    K = int(g.shape[0])
    pad = K // 2
    taps = [float(np.float32(t)) for t in g]
    _, _, H, W = x.shape

    def kernel_factory(TH):
        return _make_separable_kernel(taps, TH, W, pad)

    def scratch_factory(TH, LB):
        return [pltpu.VMEM((TH + 2 * pad, W, LB), jnp.float32)]

    return _blur_call(x, kernel_factory, scratch_factory, (), (), K,
                      flops_per_px=4 * K, tile_h=tile_h)


def blur_full(x, mk, tile_h=None):
    """Depthwise blur with an arbitrary (K, K) kernel mk (noise > 0 path)."""
    K = int(mk.shape[0])
    pad = K // 2
    _, _, H, W = x.shape
    Wp = _round_up(W + 2 * pad, SUBLANE)

    def kernel_factory(TH):
        return _make_full_kernel(K, TH, W, pad)

    def scratch_factory(TH, LB):
        return [pltpu.VMEM((TH + 2 * pad, Wp, LB), jnp.float32),   # raw rows + carry
                pltpu.VMEM((TH + 2 * pad, W, LB), jnp.float32),    # shifted column slab
                pltpu.VMEM((TH, W, LB), jnp.float32)]              # accumulator

    smem_spec = pl.BlockSpec(memory_space=pltpu.MemorySpace.SMEM)
    return _blur_call(x, kernel_factory, scratch_factory,
                      (jnp.asarray(mk, jnp.float32),), (smem_spec,), K,
                      flops_per_px=2 * K * K, tile_h=tile_h)


def gaussian_conv_blur(x, kernel, sigma, noise=0.0, noise_key=None, tile_h=None):
    """Forward pass of GaussianConvBlur.  x: NCHW float (f32 or bf16)."""
    g = cv2_gaussian_kernel_1d(kernel, sigma)
    if noise > 0:
        # Matches the module: one (K, K) noise sample, mean-subtracted, added to every
        # diagonal slice of the weight.  (RNG stream differs from torch.randn_like.)
        n = noise * jax.random.normal(noise_key, (kernel, kernel), dtype=jnp.float32)
        n = n - jnp.mean(n)
        mk = jnp.asarray(np.outer(g, g), dtype=jnp.float32) + n
        return blur_full(x, mk, tile_h=tile_h)
    return blur_separable(x, g, tile_h=tile_h)


def _reference_conv(x, mk, nch):
    """Plain-JAX replica of F.conv2d with the module's full (nch, nch, K, K) weight."""
    mk = jnp.asarray(mk, dtype=jnp.float32)
    K = mk.shape[0]
    pad = K // 2
    w = jnp.zeros((nch, nch, K, K), dtype=jnp.float32)
    w = w.at[jnp.arange(nch), jnp.arange(nch)].set(mk)
    return lax.conv_general_dilated(
        x.astype(jnp.float32), w, window_strides=(1, 1),
        padding=[(pad, pad), (pad, pad)],
        dimension_numbers=("NCHW", "OIHW", "NCHW"))


if __name__ == "__main__":
    # Module config (deterministic, synthetic): kernel=5, sigma=1.5, nch=4
    KERNEL, SIGMA, NCH = 5, 1.5, 4
    key = jax.random.PRNGKey(0)
    kx, kx2, kn = jax.random.split(key, 3)

    g = cv2_gaussian_kernel_1d(KERNEL, SIGMA)
    mk = np.outer(g, g).astype(np.float32)

    # 1) noise == 0 path, automatic tile selection, small shape (single row tile).
    x = jax.random.normal(kx, (2, NCH, 16, 16), dtype=jnp.float32)
    out = jax.block_until_ready(gaussian_conv_blur(x, KERNEL, SIGMA, noise=0.0))
    ref = jax.block_until_ready(_reference_conv(x, mk, NCH))
    assert out.shape == ref.shape == (2, NCH, 16, 16)
    np.testing.assert_allclose(np.asarray(out), np.asarray(ref), rtol=1e-5, atol=1e-5)

    # 2) noise == 0 path with a forced small row tile so the multi-step halo carry,
    #    the H / W / lane padding and the output-shift slice are all exercised.
    x2 = jax.random.normal(kx2, (2, NCH, 40, 24), dtype=jnp.float32)
    out2 = jax.block_until_ready(blur_separable(x2, g, tile_h=8))
    ref2 = jax.block_until_ready(_reference_conv(x2, mk, NCH))
    np.testing.assert_allclose(np.asarray(out2), np.asarray(ref2), rtol=1e-5, atol=1e-5)

    # 3) bf16 I/O (v5e HBM-traffic optimization): f32 accumulation in-kernel.
    out_bf = jax.block_until_ready(blur_separable(x2.astype(jnp.bfloat16), g, tile_h=8))
    np.testing.assert_allclose(np.asarray(out_bf, dtype=np.float32), np.asarray(ref2),
                               rtol=5e-2, atol=5e-2)

    # 4) noise > 0 path (general KxK kernel, SMEM weights, asymmetric weights), checked
    #    against the XLA reference conv fed the same noisy weights.
    noise = 0.1
    n = noise * jax.random.normal(kn, (KERNEL, KERNEL), dtype=jnp.float32)
    n = n - jnp.mean(n)
    mk_noisy = jnp.asarray(mk) + n
    out_n = jax.block_until_ready(blur_full(x2, mk_noisy, tile_h=8))
    ref_n = jax.block_until_ready(_reference_conv(x2, mk_noisy, NCH))
    np.testing.assert_allclose(np.asarray(out_n), np.asarray(ref_n), rtol=1e-5, atol=1e-5)

    print("KERNEL_OK")
</pallas_src>

<mosaic_0001>
module attributes {stable_mosaic.version = 11 : i64} {
  func.func @kernel(%arg0: i32, %arg1: i32, %arg2: memref<24x24x128xf32, #tpu.memory_space<vmem>>, %arg3: memref<24x16x128xf32, #tpu.memory_space<vmem>>, %arg4: memref<28x16x128xf32, #tpu.memory_space<vmem>>) attributes {dimension_semantics = [#tpu.dimension_semantics<parallel>, #tpu.dimension_semantics<arbitrary>], iteration_bounds = array<i64: 1, 1>, scalar_prefetch = 0 : i64, scratch_operands = 1 : i64, tpu.core_type = #tpu.core_type<tc>, window_params = [{transform_indices = @transform_0, window_bounds = array<i64: 24, 24, 128>}, {transform_indices = @transform_1, window_bounds = array<i64: 24, 16, 128>}]} {
    %c0_i32 = arith.constant 0 : i32
    %0 = arith.cmpi eq, %arg1, %c0_i32 : i32
    %1 = arith.extui %0 : i1 to i32
    %c0_i32_0 = arith.constant 0 : i32
    %2 = arith.cmpi ne, %1, %c0_i32_0 : i32
    scf.if %2 {
      %cst_46 = arith.constant 0.000000e+00 : f32
      %45 = vector.broadcast %cst_46 : f32 to vector<4x16x128xf32>
      %c0_47 = arith.constant 0 : index
      %c0_48 = arith.constant 0 : index
      %c0_49 = arith.constant 0 : index
      %46 = vector.load %arg4[%c0_47, %c0_48, %c0_49] : memref<28x16x128xf32, #tpu.memory_space<vmem>>, vector<4x16x128xf32>
      tpu.vector_store %arg4[%c0_47, %c0_48, %c0_49], %45 {strides = array<i32>} : memref<28x16x128xf32, #tpu.memory_space<vmem>>, vector<4x16x128xf32>,
    } else {
    }
    %c0 = arith.constant 0 : index
    %c0_1 = arith.constant 0 : index
    %c0_2 = arith.constant 0 : index
    %3 = vector.load %arg2[%c0, %c0_1, %c0_2] : memref<24x24x128xf32, #tpu.memory_space<vmem>>, vector<24x16x128xf32>
    %cst = arith.constant 0.120078385 : f32
    %4 = vector.broadcast %cst : f32 to vector<24x16x128xf32>
    %5 = arith.mulf %4, %3 : vector<24x16x128xf32>
    %c0_3 = arith.constant 0 : index
    %c1 = arith.constant 1 : index
    %c0_4 = arith.constant 0 : index
    %6 = vector.load %arg2[%c0_3, %c1, %c0_4] : memref<24x24x128xf32, #tpu.memory_space<vmem>>, vector<24x16x128xf32>
    %cst_5 = arith.constant 0.233880758 : f32
    %7 = vector.broadcast %cst_5 : f32 to vector<24x16x128xf32>
    %8 = arith.mulf %7, %6 : vector<24x16x128xf32>
    %9 = arith.addf %5, %8 : vector<24x16x128xf32>
    %c0_6 = arith.constant 0 : index
    %c2 = arith.constant 2 : index
    %c0_7 = arith.constant 0 : index
    %10 = vector.load %arg2[%c0_6, %c2, %c0_7] : memref<24x24x128xf32, #tpu.memory_space<vmem>>, vector<24x16x128xf32>
    %cst_8 = arith.constant 0.292081714 : f32
    %11 = vector.broadcast %cst_8 : f32 to vector<24x16x128xf32>
    %12 = arith.mulf %11, %10 : vector<24x16x128xf32>
    %13 = arith.addf %9, %12 : vector<24x16x128xf32>
    %c0_9 = arith.constant 0 : index
    %c3 = arith.constant 3 : index
    %c0_10 = arith.constant 0 : index
    %14 = vector.load %arg2[%c0_9, %c3, %c0_10] : memref<24x24x128xf32, #tpu.memory_space<vmem>>, vector<24x16x128xf32>
    %cst_11 = arith.constant 0.233880758 : f32
    %15 = vector.broadcast %cst_11 : f32 to vector<24x16x128xf32>
    %16 = arith.mulf %15, %14 : vector<24x16x128xf32>
    %17 = arith.addf %13, %16 : vector<24x16x128xf32>
    %c0_12 = arith.constant 0 : index
    %c4 = arith.constant 4 : index
    %c0_13 = arith.constant 0 : index
    %18 = vector.load %arg2[%c0_12, %c4, %c0_13] : memref<24x24x128xf32, #tpu.memory_space<vmem>>, vector<24x16x128xf32>
    %cst_14 = arith.constant 0.120078385 : f32
    %19 = vector.broadcast %cst_14 : f32 to vector<24x16x128xf32>
    %20 = arith.mulf %19, %18 : vector<24x16x128xf32>
    %21 = arith.addf %17, %20 : vector<24x16x128xf32>
    %c4_15 = arith.constant 4 : index
    %c0_16 = arith.constant 0 : index
    %c0_17 = arith.constant 0 : index
    %22 = vector.load %arg4[%c4_15, %c0_16, %c0_17] : memref<28x16x128xf32, #tpu.memory_space<vmem>>, vector<24x16x128xf32>
    tpu.vector_store %arg4[%c4_15, %c0_16, %c0_17], %21 {strides = array<i32>} : memref<28x16x128xf32, #tpu.memory_space<vmem>>, vector<24x16x128xf32>,
    %c0_18 = arith.constant 0 : index
    %c0_19 = arith.constant 0 : index
    %c0_20 = arith.constant 0 : index
    %23 = vector.load %arg4[%c0_18, %c0_19, %c0_20] : memref<28x16x128xf32, #tpu.memory_space<vmem>>, vector<24x16x128xf32>
    %cst_21 = arith.constant 0.120078385 : f32
    %24 = vector.broadcast %cst_21 : f32 to vector<24x16x128xf32>
    %25 = arith.mulf %24, %23 : vector<24x16x128xf32>
    %c1_22 = arith.constant 1 : index
    %c0_23 = arith.constant 0 : index
    %c0_24 = arith.constant 0 : index
    %26 = vector.load %arg4[%c1_22, %c0_23, %c0_24] : memref<28x16x128xf32, #tpu.memory_space<vmem>>, vector<24x16x128xf32>
    %cst_25 = arith.constant 0.233880758 : f32
    %27 = vector.broadcast %cst_25 : f32 to vector<24x16x128xf32>
    %28 = arith.mulf %27, %26 : vector<24x16x128xf32>
    %29 = arith.addf %25, %28 : vector<24x16x128xf32>
    %c2_26 = arith.constant 2 : index
    %c0_27 = arith.constant 0 : index
    %c0_28 = arith.constant 0 : index
    %30 = vector.load %arg4[%c2_26, %c0_27, %c0_28] : memref<28x16x128xf32, #tpu.memory_space<vmem>>, vector<24x16x128xf32>
    %cst_29 = arith.constant 0.292081714 : f32
    %31 = vector.broadcast %cst_29 : f32 to vector<24x16x128xf32>
    %32 = arith.mulf %31, %30 : vector<24x16x128xf32>
    %33 = arith.addf %29, %32 : vector<24x16x128xf32>
    %c3_30 = arith.constant 3 : index
    %c0_31 = arith.constant 0 : index
    %c0_32 = arith.constant 0 : index
    %34 = vector.load %arg4[%c3_30, %c0_31, %c0_32] : memref<28x16x128xf32, #tpu.memory_space<vmem>>, vector<24x16x128xf32>
    %cst_33 = arith.constant 0.233880758 : f32
    %35 = vector.broadcast %cst_33 : f32 to vector<24x16x128xf32>
    %36 = arith.mulf %35, %34 : vector<24x16x128xf32>
    %37 = arith.addf %33, %36 : vector<24x16x128xf32>
    %c4_34 = arith.constant 4 : index
    %c0_35 = arith.constant 0 : index
    %c0_36 = arith.constant 0 : index
    %38 = vector.load %arg4[%c4_34, %c0_35, %c0_36] : memref<28x16x128xf32, #tpu.memory_space<vmem>>, vector<24x16x128xf32>
    %cst_37 = arith.constant 0.120078385 : f32
    %39 = vector.broadcast %cst_37 : f32 to vector<24x16x128xf32>
    %40 = arith.mulf %39, %38 : vector<24x16x128xf32>
    %41 = arith.addf %37, %40 : vector<24x16x128xf32>
    %c0_38 = arith.constant 0 : index
    %c0_39 = arith.constant 0 : index
    %c0_40 = arith.constant 0 : index
    %42 = vector.load %arg3[%c0_38, %c0_39, %c0_40] : memref<24x16x128xf32, #tpu.memory_space<vmem>>, vector<24x16x128xf32>
    tpu.vector_store %arg3[%c0_38, %c0_39, %c0_40], %41 {strides = array<i32>} : memref<24x16x128xf32, #tpu.memory_space<vmem>>, vector<24x16x128xf32>,
    %c24 = arith.constant 24 : index
    %c0_41 = arith.constant 0 : index
    %c0_42 = arith.constant 0 : index
    %43 = vector.load %arg4[%c24, %c0_41, %c0_42] : memref<28x16x128xf32, #tpu.memory_space<vmem>>, vector<4x16x128xf32>
    %c0_43 = arith.constant 0 : index
    %c0_44 = arith.constant 0 : index
    %c0_45 = arith.constant 0 : index
    %44 = vector.load %arg4[%c0_43, %c0_44, %c0_45] : memref<28x16x128xf32, #tpu.memory_space<vmem>>, vector<4x16x128xf32>
    tpu.vector_store %arg4[%c0_43, %c0_44, %c0_45], %43 {strides = array<i32>} : memref<28x16x128xf32, #tpu.memory_space<vmem>>, vector<4x16x128xf32>,
    return
  }
  func.func @transform_0(%arg0: i32, %arg1: i32) -> (i32, i32, i32) {
    %c0_i32 = arith.constant 0 : i32
    %c0_i32_0 = arith.constant 0 : i32
    return %arg1, %c0_i32, %arg0 : i32, i32, i32
  }
  func.func @transform_1(%arg0: i32, %arg1: i32) -> (i32, i32, i32) {
    %c0_i32 = arith.constant 0 : i32
    %c0_i32_0 = arith.constant 0 : i32
    return %arg1, %c0_i32, %arg0 : i32, i32, i32
  }
}

</mosaic_0001>

<bundles_post_ra>
// kernel: tpu_custom_call.1
= control target key start
LH: loop header
LB: loop body
LE: loop exit
PB: predicated region body
PF: predicated region fallthrough
CT: control target
= control target key end

     0   :  { %6 = vsyncpa [#allocation4], 0  ;;  %s2067_s0 = inlined_call_operand.hbm [shape: f32[24,24,128], index: 0, kind: input, shape index: {}]   ;;  %s2068_s1 = inlined_call_operand.hbm [shape: f32[24,16,128], index: 1, kind: output, shape index: {}]  }
   0x1   :  { %7 = vsyncpa [#allocation5], 0  ;;  %s12_s8 = sshll.u32 %s2067_s0, 4  ;;  %s1573_s9 = smov [#allocation3]   ;;  %s13_s8 = int_to_ptr.hbm [resolvable:$true] %s12_s8 }
   0x2   :  { %s14_s10 = sshll.u32 %s1573_s9, 4  ;;  %s1574_s11 = smov 128   ;;  %s15_s10 = int_to_ptr.vmem [resolvable:$true] %s14_s10 }
   0x3   :  { %s1575_s12 = smov 8  }
   0x4   :  { %20 = dma.hbm_to_vmem [thread:$0]  %s13_s8, 9216, %s15_s10, [#allocation4], %s1574_s11, %s1574_s11, %s1575_s12  }
   0x5   :  { %1569 = dma.done.wait [#allocation4], 9216  }
   0x6   :  { %1570 = vsyncadd [#allocation4], 4294958080  ;;  %v37_v0 = vld [vmem:[#allocation3] sm:$0xff]  ;;  %v39_v1 = vld [vmem:[#allocation3 + $0x18] sm:$0xff]  ;;  %s1576_s0 = smov [#allocation6]   ;;  %s1504_s16 = sshll.u32 %s2068_s1, 4  ;;  %s1505_s16 = int_to_ptr.hbm [resolvable:$true] %s1504_s16 }
   0x7   :  { %v133_v2 = vld [vmem:[#allocation3 + $0x1] sm:$0xff]  ;;  %v85_v3 = vmul.f32 0.120078385, %v37_v0  ;;  %v87_v4 = vmul.f32 0.120078385, %v39_v1  ;;  %v135_v5 = vld [vmem:[#allocation3 + $0x19] sm:$0xff] }
   0x8   :  { %v277_v6 = vld [vmem:[#allocation3 + $0x2] sm:$0xff]  ;;  %v181_v7 = vmul.f32 0.23388076, %v133_v2  ;;  %v183_v8 = vmul.f32 0.23388076, %v135_v5  ;;  %v279_v9 = vld [vmem:[#allocation3 + $0x1a] sm:$0xff] }
   0x9   :  { %v421_v10 = vld [vmem:[#allocation3 + $0x3] sm:$0xff]  ;;  %v325_v11 = vmul.f32 0.2920817, %v277_v6  ;;  %v327_v12 = vmul.f32 0.2920817, %v279_v9  ;;  %v423_v13 = vld [vmem:[#allocation3 + $0x1b] sm:$0xff] }
   0xa   :  { %v565_v14 = vld [vmem:[#allocation3 + $0x4] sm:$0xff]  ;;  %v229_v15 = vadd.f32 %v181_v7, %v85_v3  ;;  %v231_v16 = vadd.f32 %v183_v8, %v87_v4  ;;  %v469_v17 = vmul.f32 0.23388076, %v421_v10  ;;  %v471_v18 = vmul.f32 0.23388076, %v423_v13  ;;  %v567_v19 = vld [vmem:[#allocation3 + $0x1c] sm:$0xff] }
   0xb   :  { %v38_v20 = vld [vmem:[#allocation3 + $0x8] sm:$0xff]  ;;  %v613_v21 = vmul.f32 0.120078385, %v565_v14  ;;  %v615_v22 = vmul.f32 0.120078385, %v567_v19  ;;  %v40_v23 = vld [vmem:[#allocation3 + $0x20] sm:$0xff] }
   0xc   :  { %v134_v24 = vld [vmem:[#allocation3 + $0x9] sm:$0xff]  ;;  %v373_v25 = vadd.f32 %v325_v11, %v229_v15  ;;  %v375_v26 = vadd.f32 %v327_v12, %v231_v16  ;;  %v86_v27 = vmul.f32 0.120078385, %v38_v20  ;;  %v88_v28 = vmul.f32 0.120078385, %v40_v23  ;;  %v136_v29 = vld [vmem:[#allocation3 + $0x21] sm:$0xff] }
   0xd   :  { %v278_v30 = vld [vmem:[#allocation3 + $0xa] sm:$0xff]  ;;  %v182_v31 = vmul.f32 0.23388076, %v134_v24  ;;  %v184_v32 = vmul.f32 0.23388076, %v136_v29  ;;  %v280_v33 = vld [vmem:[#allocation3 + $0x22] sm:$0xff] }
   0xe   :  { %v422_v34 = vld [vmem:[#allocation3 + $0xb] sm:$0xff]  ;;  %v517_v35 = vadd.f32 %v469_v17, %v373_v25  ;;  %v519_v36 = vadd.f32 %v471_v18, %v375_v26  ;;  %v326_v37 = vmul.f32 0.2920817, %v278_v30  ;;  %v328_v38 = vmul.f32 0.2920817, %v280_v33  ;;  %v424_v39 = vld [vmem:[#allocation3 + $0x23] sm:$0xff] }
   0xf   :  { %v566_v40 = vld [vmem:[#allocation3 + $0xc] sm:$0xff]  ;;  %v230_v41 = vadd.f32 %v182_v31, %v86_v27  ;;  %v232_v42 = vadd.f32 %v184_v32, %v88_v28  ;;  %v470_v43 = vmul.f32 0.23388076, %v422_v34  ;;  %v472_v44 = vmul.f32 0.23388076, %v424_v39  ;;  %v568_v45 = vld [vmem:[#allocation3 + $0x24] sm:$0xff] }
  0x10   :  { %v41_v46 = vld [vmem:[#allocation3 + $0x30] sm:$0xff]  ;;  %v661_v47 = vadd.f32 %v613_v21, %v517_v35  ;;  %v1593_v48 = vadd.f32 %v615_v22, %v519_v36  ;;  %v614_v49 = vmul.f32 0.120078385, %v566_v40  ;;  %v616_v50 = vmul.f32 0.120078385, %v568_v45  ;;  %v42_v2 = vld [vmem:[#allocation3 + $0x38] sm:$0xff] }
  0x11   :  { %v137_v51 = vld [vmem:[#allocation3 + $0x31] sm:$0xff]  ;;  %v374_v53 = vadd.f32 %v326_v37, %v230_v41  ;;  %v376_v54 = vadd.f32 %v328_v38, %v232_v42  ;;  %v89_v55 = vmul.f32 0.120078385, %v41_v46  ;;  %v138_v3 = vld [vmem:[#allocation3 + $0x39] sm:$0xff]  ;;  %v43_v13 = vld [vmem:[#allocation3 + $0x48] sm:$0xff]  ;;  %s1502_s13 = sshll.u32 %s1576_s0, 4  ;;  %s1503_s13 = int_to_ptr.vmem [resolvable:$true] %s1502_s13 }
  0x12   :  { %v281_v52 = vld [vmem:[#allocation3 + $0x32] sm:$0xff]  ;;  %v185_v56 = vmul.f32 0.23388076, %v137_v51  ;;  %v1595_v59 = vmul.f32 0.120078385, %v661_v47  ;;  %v282_v4 = vld [vmem:[#allocation3 + $0x3a] sm:$0xff] }
  0x13   :  { %v425_v57 = vld [vmem:[#allocation3 + $0x33] sm:$0xff]  ;;  %v1598_v60 = vmul.f32 0.23388076, %v1593_v48  ;;  %v329_v61 = vmul.f32 0.2920817, %v281_v52  ;;  %v518_v62 = vadd.f32 %v470_v43, %v374_v53  ;;  %v520_v63 = vadd.f32 %v472_v44, %v376_v54  ;;  %v426_v7 = vld [vmem:[#allocation3 + $0x3b] sm:$0xff] }
  0x14   :  { %v569_v58 = vld [vmem:[#allocation3 + $0x34] sm:$0xff]  ;;  %v233_v0 = vadd.f32 %v185_v56, %v89_v55  ;;  %v473_v1 = vmul.f32 0.23388076, %v425_v57  ;;  %1433 = vst [vmem:[#allocation6] sm:$0xff] %v1595_v59  ;;  %v1602_v6 = vmul.f32 0.120078385, %v1593_v48 }
  0x15   :  { %v617_v5 = vmul.f32 0.120078385, %v569_v58  ;;  %v662_v8 = vadd.f32 %v614_v49, %v518_v62  ;;  %v1604_v9 = vadd.f32 %v616_v50, %v520_v63  ;;  %v1606_v11 = vmul.f32 0.23388076, %v661_v47  ;;  %v570_v12 = vld [vmem:[#allocation3 + $0x3c] sm:$0xff]  ;;  %v139_v14 = vld [vmem:[#allocation3 + $0x49] sm:$0xff] }
  0x16   :  { %v377_v10 = vadd.f32 %v329_v61, %v233_v0  ;;  %v90_v15 = vmul.f32 0.120078385, %v42_v2  ;;  %v186_v16 = vmul.f32 0.23388076, %v138_v3  ;;  %v330_v17 = vmul.f32 0.2920817, %v282_v4 }
  0x17   :  { %v1608_v18 = vmul.f32 0.120078385, %v662_v8  ;;  %v1611_v19 = vmul.f32 0.23388076, %v1604_v9  ;;  %v1387_v21 = vadd.f32 %v1606_v11, %v1602_v6  ;;  %v283_v22 = vld [vmem:[#allocation3 + $0x4a] sm:$0xff]  ;;  %v284_v44 = vld [vmem:[#allocation3 + $0x52] sm:$0xff] }
  0x18   :  { %v521_v20 = vadd.f32 %v473_v1, %v377_v10  ;;  %v427_v23 = vld [vmem:[#allocation3 + $0x4b] sm:$0xff]  ;;  %v234_v24 = vadd.f32 %v186_v16, %v90_v15  ;;  %v474_v25 = vmul.f32 0.23388076, %v426_v7  ;;  %v618_v26 = vmul.f32 0.120078385, %v570_v12  ;;  %v428_v49 = vld [vmem:[#allocation3 + $0x53] sm:$0xff] }
  0x19   :  { %v1616_v27 = vmul.f32 0.120078385, %v1604_v9  ;;  %1434 = vst [vmem:[#allocation6 + $0x8] sm:$0xff] %v1608_v18  ;;  %v1621_v29 = vmul.f32 0.23388076, %v662_v8  ;;  %v44_v34 = vld [vmem:[#allocation3 + $0x50] sm:$0xff] }
  0x1a   :  { %v1619_v28 = vadd.f32 %v617_v5, %v521_v20  ;;  %v91_v30 = vmul.f32 0.120078385, %v43_v13  ;;  %1435 = vst [vmem:[#allocation6 + $0x10] sm:$0xff] %v1387_v21  ;;  %v378_v31 = vadd.f32 %v330_v17, %v234_v24  ;;  %v187_v32 = vmul.f32 0.23388076, %v139_v14  ;;  %v571_v38 = vld [vmem:[#allocation3 + $0x4c] sm:$0xff] }
  0x1b   :  { %v331_v33 = vmul.f32 0.2920817, %v283_v22  ;;  %v1388_v36 = vadd.f32 %v1621_v29, %v1616_v27  ;;  %v475_v37 = vmul.f32 0.23388076, %v427_v23  ;;  %v1052_v42 = vmul.f32 0.2920817, %v661_v47 }
  0x1c   :  { %v1624_v35 = vmul.f32 0.23388076, %v1619_v28  ;;  %v522_v39 = vadd.f32 %v474_v25, %v378_v31  ;;  %v235_v40 = vadd.f32 %v187_v32, %v91_v30  ;;  %v1629_v41 = vmul.f32 0.120078385, %v1619_v28  ;;  %v140_v43 = vld [vmem:[#allocation3 + $0x51] sm:$0xff]  ;;  %v45_v55 = vld [vmem:[#allocation3 + $0x60] sm:$0xff] }
  0x1d   :  { %1436 = vst [vmem:[#allocation6 + $0x18] sm:$0xff] %v1388_v36  ;;  %v92_v45 = vmul.f32 0.120078385, %v44_v34  ;;  %v188_v46 = vmul.f32 0.23388076, %v140_v43  ;;  %v1245_v52 = vadd.f32 %v1052_v42, %v1598_v60  ;;  %v572_v54 = vld [vmem:[#allocation3 + $0x54] sm:$0xff] }
  0x1e   :  { %v1631_v50 = vadd.f32 %v618_v26, %v522_v39  ;;  %v379_v51 = vadd.f32 %v331_v33, %v235_v40  ;;  %v332_v53 = vmul.f32 0.2920817, %v284_v44  ;;  %v141_v56 = vld [vmem:[#allocation3 + $0x61] sm:$0xff]  ;;  %v619_v57 = vmul.f32 0.120078385, %v571_v38  ;;  %v142_v14 = vld [vmem:[#allocation3 + $0x69] sm:$0xff] }
  0x1f   :  { %v236_v58 = vadd.f32 %v188_v46, %v92_v45  ;;  %v476_v61 = vmul.f32 0.23388076, %v428_v49  ;;  %v1053_v62 = vmul.f32 0.2920817, %v662_v8  ;;  %v1389_v63 = vadd.f32 %v1245_v52, %v1629_v41  ;;  %v285_v2 = vld [vmem:[#allocation3 + $0x62] sm:$0xff]  ;;  %v286_v21 = vld [vmem:[#allocation3 + $0x6a] sm:$0xff] }
  0x20   :  { %v523_v47 = vadd.f32 %v475_v37, %v379_v51  ;;  %v620_v0 = vmul.f32 0.120078385, %v572_v54  ;;  %v1636_v1 = vmul.f32 0.120078385, %v1631_v50  ;;  %v429_v3 = vld [vmem:[#allocation3 + $0x63] sm:$0xff]  ;;  %v430_v25 = vld [vmem:[#allocation3 + $0x6b] sm:$0xff] }
  0x21   :  { %v380_v4 = vadd.f32 %v332_v53, %v236_v58  ;;  %v1246_v5 = vadd.f32 %v1053_v62, %v1611_v19  ;;  %v93_v7 = vmul.f32 0.120078385, %v45_v55  ;;  %v189_v10 = vmul.f32 0.23388076, %v141_v56  ;;  %1437 = vst [vmem:[#allocation6 + $0x20] sm:$0xff] %v1389_v63  ;;  %v46_v13 = vld [vmem:[#allocation3 + $0x68] sm:$0xff] }
  0x22   :  { %v333_v12 = vmul.f32 0.2920817, %v285_v2  ;;  %v477_v17 = vmul.f32 0.23388076, %v429_v3  ;;  %v573_v20 = vld [vmem:[#allocation3 + $0x64] sm:$0xff]  ;;  %v1643_v23 = vadd.f32 %v619_v57, %v523_v47  ;;  %v47_v32 = vld [vmem:[#allocation3 + $0x78] sm:$0xff] }
  0x23   :  { %v524_v15 = vadd.f32 %v476_v61, %v380_v4  ;;  %v1390_v8 = vadd.f32 %v1246_v5, %v1636_v1  ;;  %v237_v16 = vadd.f32 %v189_v10, %v93_v7  ;;  %v1641_v22 = vmul.f32 0.23388076, %v1631_v50  ;;  %v143_v37 = vld [vmem:[#allocation3 + $0x79] sm:$0xff]  ;;  %v574_v43 = vld [vmem:[#allocation3 + $0x6c] sm:$0xff]  ;;  %v288_v63 = vld [vmem:[#allocation3 + $0x82] sm:$0xff] }
  0x24   :  { %v1054_v24 = vmul.f32 0.2920817, %v1593_v48  ;;  %v94_v30 = vmul.f32 0.120078385, %v46_v13  ;;  %v190_v31 = vmul.f32 0.23388076, %v142_v14 }
  0x25   :  { %1438 = vst [vmem:[#allocation6 + $0x28] sm:$0xff] %v1390_v8  ;;  %v381_v26 = vadd.f32 %v333_v12, %v237_v16  ;;  %v621_v33 = vmul.f32 0.120078385, %v573_v20  ;;  %v334_v36 = vmul.f32 0.2920817, %v286_v21  ;;  %v1647_v38 = vadd.f32 %v620_v0, %v524_v15  ;;  %v287_v44 = vld [vmem:[#allocation3 + $0x7a] sm:$0xff] }
  0x26   :  { %v1102_v34 = vadd.f32 %v1054_v24, %v1606_v11  ;;  %v238_v40 = vadd.f32 %v190_v31, %v94_v30  ;;  %v478_v42 = vmul.f32 0.23388076, %v430_v25  ;;  %v1650_v48 = vmul.f32 0.120078385, %v1643_v23  ;;  %v431_v54 = vld [vmem:[#allocation3 + $0x7b] sm:$0xff]  ;;  %v432_v12 = vld [vmem:[#allocation3 + $0x83] sm:$0xff] }
  0x27   :  { %v525_v39 = vadd.f32 %v477_v17, %v381_v26  ;;  %v1055_v46 = vmul.f32 0.2920817, %v1604_v9  ;;  %v95_v49 = vmul.f32 0.120078385, %v47_v32  ;;  %v959_v11 = vadd.f32 %v1598_v60, %v1595_v59  ;;  %v48_v61 = vld [vmem:[#allocation3 + $0x80] sm:$0xff]  ;;  %v49_v16 = vld [vmem:[#allocation3 + $0x90] sm:$0xff] }
  0x28   :  { %v1247_v45 = vadd.f32 %v1102_v34, %v1624_v35  ;;  %v1657_v51 = vmul.f32 0.23388076, %v1643_v23  ;;  %v382_v52 = vadd.f32 %v334_v36, %v238_v40  ;;  %v191_v53 = vmul.f32 0.23388076, %v143_v37  ;;  %v144_v60 = vld [vmem:[#allocation3 + $0x81] sm:$0xff]  ;;  %v145_v17 = vld [vmem:[#allocation3 + $0x91] sm:$0xff] }
  0x29   :  { %v622_v56 = vmul.f32 0.120078385, %v574_v43  ;;  %v1103_v57 = vadd.f32 %v1055_v46, %v1621_v29  ;;  %v335_v58 = vmul.f32 0.2920817, %v287_v44  ;;  %v1661_v62 = vadd.f32 %v621_v33, %v525_v39  ;;  %v575_v3 = vld [vmem:[#allocation3 + $0x7c] sm:$0xff]  ;;  %v576_v26 = vld [vmem:[#allocation3 + $0x84] sm:$0xff] }
  0x2a   :  { %v1391_v55 = vadd.f32 %v1247_v45, %v1650_v48  ;;  %v526_v9 = vadd.f32 %v478_v42, %v382_v52  ;;  %v1664_v47 = vmul.f32 0.120078385, %v1647_v38  ;;  %v239_v59 = vadd.f32 %v191_v53, %v95_v49  ;;  %v433_v31 = vld [vmem:[#allocation3 + $0x93] sm:$0xff]  ;;  %v434_v53 = vld [vmem:[#allocation3 + $0x9b] sm:$0xff] }
  0x2b   :  { %v1248_v0 = vadd.f32 %v1103_v57, %v1641_v22  ;;  %v479_v2 = vmul.f32 0.23388076, %v431_v54  ;;  %v1056_v4 = vmul.f32 0.2920817, %v1619_v28  ;;  %v960_v29 = vadd.f32 %v1611_v19, %v1608_v18  ;;  %v289_v18 = vld [vmem:[#allocation3 + $0x92] sm:$0xff] }
  0x2c   :  { %1439 = vst [vmem:[#allocation6 + $0x30] sm:$0xff] %v1391_v55  ;;  %v1671_v5 = vmul.f32 0.23388076, %v1647_v38  ;;  %v383_v7 = vadd.f32 %v335_v58, %v239_v59  ;;  %v96_v10 = vmul.f32 0.120078385, %v48_v61  ;;  %v1674_v20 = vadd.f32 %v622_v56, %v526_v9  ;;  %v50_v43 = vld [vmem:[#allocation3 + $0x98] sm:$0xff] }
  0x2d   :  { %v1392_v13 = vadd.f32 %v1248_v0, %v1664_v47  ;;  %v1104_v14 = vadd.f32 %v1056_v4, %v959_v11  ;;  %v192_v15 = vmul.f32 0.23388076, %v144_v60  ;;  %v336_v8 = vmul.f32 0.2920817, %v288_v63  ;;  %v146_v44 = vld [vmem:[#allocation3 + $0x99] sm:$0xff]  ;;  %v51_v63 = vld [vmem:[#allocation3 + $0xa8] sm:$0xff] }
  0x2e   :  { %v623_v21 = vmul.f32 0.120078385, %v575_v3  ;;  %v1677_v28 = vmul.f32 0.120078385, %v1661_v62  ;;  %v527_v19 = vadd.f32 %v479_v2, %v383_v7  ;;  %v1057_v30 = vmul.f32 0.2920817, %v1631_v50 }
  0x2f   :  { %1440 = vst [vmem:[#allocation6 + $0x38] sm:$0xff] %v1392_v13  ;;  %v1249_v24 = vadd.f32 %v1104_v14, %v1657_v51  ;;  %v240_v25 = vadd.f32 %v192_v15, %v96_v10  ;;  %v961_v32 = vadd.f32 %v1624_v35, %v1602_v6  ;;  %v480_v33 = vmul.f32 0.23388076, %v432_v12  ;;  %v290_v50 = vld [vmem:[#allocation3 + $0x9a] sm:$0xff]  ;;  %v147_v4 = vld [vmem:[#allocation3 + $0xa9] sm:$0xff] }
  0x30   :  { %v97_v34 = vmul.f32 0.120078385, %v49_v16  ;;  %v193_v36 = vmul.f32 0.23388076, %v145_v17  ;;  %v1105_v40 = vadd.f32 %v1057_v30, %v960_v29  ;;  %v337_v42 = vmul.f32 0.2920817, %v289_v18 }
  0x31   :  { %v1393_v37 = vadd.f32 %v1249_v24, %v1677_v28  ;;  %v384_v39 = vadd.f32 %v336_v8, %v240_v25  ;;  %v624_v45 = vmul.f32 0.120078385, %v576_v26  ;;  %v1685_v46 = vmul.f32 0.120078385, %v1674_v20  ;;  %v577_v56 = vld [vmem:[#allocation3 + $0x94] sm:$0xff]  ;;  %v291_v29 = vld [vmem:[#allocation3 + $0xaa] sm:$0xff] }
  0x32   :  { %v241_v49 = vadd.f32 %v193_v36, %v97_v34  ;;  %v1687_v11 = vadd.f32 %v623_v21, %v527_v19  ;;  %v1250_v6 = vadd.f32 %v1105_v40, %v1671_v5  ;;  %v481_v35 = vmul.f32 0.23388076, %v433_v31  ;;  %v578_v14 = vld [vmem:[#allocation3 + $0x9c] sm:$0xff]  ;;  %v435_v16 = vld [vmem:[#allocation3 + $0xab] sm:$0xff]  ;;  %v436_v40 = vld [vmem:[#allocation3 + $0xb3] sm:$0xff] }
  0x33   :  { %1441 = vst [vmem:[#allocation6 + $0x40] sm:$0xff] %v1393_v37  ;;  %v1058_v52 = vmul.f32 0.2920817, %v1643_v23  ;;  %v528_v54 = vadd.f32 %v480_v33, %v384_v39  ;;  %v98_v57 = vmul.f32 0.120078385, %v50_v43  ;;  %v962_v0 = vadd.f32 %v1641_v22, %v1616_v27  ;;  %v52_v31 = vld [vmem:[#allocation3 + $0xb0] sm:$0xff] }
  0x34   :  { %v385_v55 = vadd.f32 %v337_v42, %v241_v49  ;;  %v194_v58 = vmul.f32 0.23388076, %v146_v44  ;;  %v1692_v61 = vmul.f32 0.23388076, %v1661_v62  ;;  %v1394_v9 = vadd.f32 %v1250_v6, %v1685_v46  ;;  %v292_v33 = vld [vmem:[#allocation3 + $0xb2] sm:$0xff]  ;;  %v53_v42 = vld [vmem:[#allocation3 + $0xc0] sm:$0xff] }
  0x35   :  { %v1106_v59 = vadd.f32 %v1058_v52, %v961_v32  ;;  %v338_v60 = vmul.f32 0.2920817, %v290_v50  ;;  %v1698_v2 = vmul.f32 0.23388076, %v1674_v20  ;;  %v482_v3 = vmul.f32 0.23388076, %v434_v53 }
  0x36   :  { %v242_v23 = vadd.f32 %v194_v58, %v98_v57  ;;  %1442 = vst [vmem:[#allocation6 + $0x48] sm:$0xff] %v1394_v9  ;;  %v529_v7 = vadd.f32 %v481_v35, %v385_v55  ;;  %v625_v10 = vmul.f32 0.120078385, %v577_v56  ;;  %v1701_v12 = vmul.f32 0.120078385, %v1687_v11  ;;  %v148_v32 = vld [vmem:[#allocation3 + $0xb1] sm:$0xff] }
  0x37   :  { %v1251_v13 = vadd.f32 %v1106_v59, %v1692_v61  ;;  %v1704_v15 = vadd.f32 %v624_v45, %v528_v54  ;;  %v1059_v27 = vmul.f32 0.2920817, %v1647_v38  ;;  %v99_v22 = vmul.f32 0.120078385, %v51_v63  ;;  %v579_v39 = vld [vmem:[#allocation3 + $0xac] sm:$0xff]  ;;  %v149_v53 = vld [vmem:[#allocation3 + $0xc1] sm:$0xff] }
  0x38   :  { %v386_v8 = vadd.f32 %v338_v60, %v242_v23  ;;  %v1708_v17 = vmul.f32 0.23388076, %v1687_v11  ;;  %v195_v18 = vmul.f32 0.23388076, %v147_v4  ;;  %v339_v19 = vmul.f32 0.2920817, %v291_v29 }
  0x39   :  { %v1395_v21 = vadd.f32 %v1251_v13, %v1701_v12  ;;  %v963_v24 = vadd.f32 %v1657_v51, %v1629_v41  ;;  %v626_v26 = vmul.f32 0.120078385, %v578_v14  ;;  %v1107_v30 = vadd.f32 %v1059_v27, %v962_v0  ;;  %v293_v54 = vld [vmem:[#allocation3 + $0xc2] sm:$0xff]  ;;  %v580_v9 = vld [vmem:[#allocation3 + $0xb4] sm:$0xff] }
  0x3a   :  { %v530_v25 = vadd.f32 %v482_v3, %v386_v8  ;;  %v964_v38 = vadd.f32 %v1671_v5, %v1636_v1  ;;  %v1715_v34 = vadd.f32 %v625_v10, %v529_v7  ;;  %v243_v36 = vadd.f32 %v195_v18, %v99_v22  ;;  %v437_v63 = vld [vmem:[#allocation3 + $0xc3] sm:$0xff] }
  0x3b   :  { %1443 = vst [vmem:[#allocation6 + $0x50] sm:$0xff] %v1395_v21  ;;  %v483_v37 = vmul.f32 0.23388076, %v435_v16  ;;  %v1718_v43 = vmul.f32 0.23388076, %v1704_v15  ;;  %v1252_v51 = vadd.f32 %v1107_v30, %v1698_v2  ;;  %v965_v0 = vadd.f32 %v1692_v61, %v1650_v48  ;;  %v54_v29 = vld [vmem:[#allocation3 + $0xc8] sm:$0xff] }
  0x3c   :  { %v1721_v41 = vmul.f32 0.120078385, %v1704_v15  ;;  %v1060_v44 = vmul.f32 0.2920817, %v1661_v62  ;;  %v387_v45 = vadd.f32 %v339_v19, %v243_v36  ;;  %v100_v1 = vmul.f32 0.120078385, %v52_v31 }
  0x3d   :  { %v196_v5 = vmul.f32 0.23388076, %v148_v32  ;;  %v340_v49 = vmul.f32 0.2920817, %v292_v33  ;;  %v1725_v50 = vadd.f32 %v626_v26, %v530_v25  ;;  %v627_v35 = vmul.f32 0.120078385, %v579_v39 }
  0x3e   :  { %v1396_v6 = vadd.f32 %v1252_v51, %v1721_v41  ;;  %v1108_v52 = vadd.f32 %v1060_v44, %v963_v24  ;;  %v531_v55 = vadd.f32 %v483_v37, %v387_v45  ;;  %v1729_v56 = vmul.f32 0.120078385, %v1715_v34  ;;  %v150_v8 = vld [vmem:[#allocation3 + $0xc9] sm:$0xff]  ;;  %v55_v37 = vld [vmem:[#allocation3 + $0xd8] sm:$0xff] }
  0x3f   :  { %v244_v57 = vadd.f32 %v196_v5, %v100_v1  ;;  %v484_v58 = vmul.f32 0.23388076, %v436_v40  ;;  %v1061_v59 = vmul.f32 0.2920817, %v1674_v20  ;;  %v101_v60 = vmul.f32 0.120078385, %v53_v42 }
  0x40   :  { %1444 = vst [vmem:[#allocation6 + $0x58] sm:$0xff] %v1396_v6  ;;  %v1253_v62 = vadd.f32 %v1108_v52, %v1708_v17  ;;  %v197_v3 = vmul.f32 0.23388076, %v149_v53  ;;  %v341_v4 = vmul.f32 0.2920817, %v293_v54  ;;  %v1739_v27 = vadd.f32 %v627_v35, %v531_v55  ;;  %v581_v21 = vld [vmem:[#allocation3 + $0xc4] sm:$0xff] }
  0x41   :  { %v388_v23 = vadd.f32 %v340_v49, %v244_v57  ;;  %v628_v10 = vmul.f32 0.120078385, %v580_v9  ;;  %v1737_v13 = vmul.f32 0.120078385, %v1725_v50  ;;  %v1109_v14 = vadd.f32 %v1061_v59, %v964_v38  ;;  %v294_v18 = vld [vmem:[#allocation3 + $0xca] sm:$0xff]  ;;  %v439_v52 = vld [vmem:[#allocation3 + $0xdb] sm:$0xff] }
  0x42   :  { %v1397_v7 = vadd.f32 %v1253_v62, %v1729_v56  ;;  %v245_v22 = vadd.f32 %v197_v3, %v101_v60  ;;  %v485_v16 = vmul.f32 0.23388076, %v437_v63  ;;  %v1062_v61 = vmul.f32 0.2920817, %v1687_v11  ;;  %v438_v31 = vld [vmem:[#allocation3 + $0xcb] sm:$0xff]  ;;  %v56_v53 = vld [vmem:[#allocation3 + $0xe0] sm:$0xff] }
  0x43   :  { %v532_v20 = vadd.f32 %v484_v58, %v388_v23  ;;  %v1254_v48 = vadd.f32 %v1109_v14, %v1718_v43  ;;  %v102_v19 = vmul.f32 0.120078385, %v54_v29  ;;  %v966_v24 = vadd.f32 %v1698_v2, %v1664_v47  ;;  %v151_v47 = vld [vmem:[#allocation3 + $0xd9] sm:$0xff]  ;;  %v582_v45 = vld [vmem:[#allocation3 + $0xcc] sm:$0xff]  ;;  %v152_v9 = vld [vmem:[#allocation3 + $0xe1] sm:$0xff] }
  0x44   :  { %1445 = vst [vmem:[#allocation6 + $0x60] sm:$0xff] %v1397_v7  ;;  %v1746_v25 = vmul.f32 0.23388076, %v1715_v34  ;;  %v389_v26 = vadd.f32 %v341_v4, %v245_v22  ;;  %v198_v30 = vmul.f32 0.23388076, %v150_v8  ;;  %v1110_v38 = vadd.f32 %v1062_v61, %v965_v0  ;;  %v295_v2 = vld [vmem:[#allocation3 + $0xda] sm:$0xff] }
  0x45   :  { %v1398_v32 = vadd.f32 %v1254_v48, %v1737_v13  ;;  %v629_v33 = vmul.f32 0.120078385, %v581_v21  ;;  %v342_v36 = vmul.f32 0.2920817, %v294_v18  ;;  %v1749_v39 = vadd.f32 %v628_v10, %v532_v20  ;;  %v296_v62 = vld [vmem:[#allocation3 + $0xe2] sm:$0xff]  ;;  %v57_v21 = vld [vmem:[#allocation3 + $0xf0] sm:$0xff] }
  0x46   :  { %v533_v40 = vadd.f32 %v485_v16, %v389_v26  ;;  %v1752_v11 = vmul.f32 0.120078385, %v1739_v27  ;;  %v246_v42 = vadd.f32 %v198_v30, %v102_v19  ;;  %v1255_v51 = vadd.f32 %v1110_v38, %v1746_v25  ;;  %v583_v23 = vld [vmem:[#allocation3 + $0xdc] sm:$0xff]  ;;  %v153_v18 = vld [vmem:[#allocation3 + $0xf1] sm:$0xff] }
  0x47   :  { %1446 = vst [vmem:[#allocation6 + $0x68] sm:$0xff] %v1398_v32  ;;  %v486_v44 = vmul.f32 0.23388076, %v438_v31  ;;  %v1063_v1 = vmul.f32 0.2920817, %v1704_v15  ;;  %v967_v5 = vadd.f32 %v1708_v17, %v1677_v28  ;;  %v440_v4 = vld [vmem:[#allocation3 + $0xe3] sm:$0xff]  ;;  %v968_v29 = vadd.f32 %v1718_v43, %v1685_v46 }
  0x48   :  { %v1759_v49 = vmul.f32 0.23388076, %v1725_v50  ;;  %v390_v6 = vadd.f32 %v342_v36, %v246_v42  ;;  %v103_v35 = vmul.f32 0.120078385, %v55_v37  ;;  %v1399_v54 = vadd.f32 %v1255_v51, %v1752_v11  ;;  %v441_v30 = vld [vmem:[#allocation3 + $0xf3] sm:$0xff] }
  0x49   :  { %v1111_v55 = vadd.f32 %v1063_v1, %v966_v24  ;;  %v199_v57 = vmul.f32 0.23388076, %v151_v47  ;;  %v343_v58 = vmul.f32 0.2920817, %v295_v2  ;;  %v1763_v59 = vmul.f32 0.23388076, %v1739_v27 }
  0x4a   :  { %v1765_v15 = vadd.f32 %v629_v33, %v533_v40  ;;  %v630_v28 = vmul.f32 0.120078385, %v582_v45  ;;  %v1768_v17 = vmul.f32 0.120078385, %v1749_v39  ;;  %1447 = vst [vmem:[#allocation6 + $0x70] sm:$0xff] %v1399_v54  ;;  %v534_v60 = vadd.f32 %v486_v44, %v390_v6  ;;  %v584_v33 = vld [vmem:[#allocation3 + $0xe4] sm:$0xff] }
  0x4b   :  { %v1256_v63 = vadd.f32 %v1111_v55, %v1759_v49  ;;  %v247_v0 = vadd.f32 %v199_v57, %v103_v35  ;;  %v1064_v3 = vmul.f32 0.2920817, %v1715_v34  ;;  %v487_v7 = vmul.f32 0.23388076, %v439_v52  ;;  %v297_v34 = vld [vmem:[#allocation3 + $0xf2] sm:$0xff] }
  0x4c   :  { %v104_v10 = vmul.f32 0.120078385, %v56_v53  ;;  %v200_v14 = vmul.f32 0.23388076, %v152_v9  ;;  %v344_v16 = vmul.f32 0.2920817, %v296_v62  ;;  %v1778_v24 = vadd.f32 %v630_v28, %v534_v60 }
  0x4d   :  { %v1400_v8 = vadd.f32 %v1256_v63, %v1768_v17  ;;  %v391_v20 = vadd.f32 %v343_v58, %v247_v0  ;;  %v1112_v22 = vadd.f32 %v1064_v3, %v967_v5  ;;  %v631_v48 = vmul.f32 0.120078385, %v583_v23  ;;  %v58_v2 = vld [vmem:[#allocation3 + $0xf8] sm:$0xff]  ;;  %v59_v60 = vld [vmem:[#allocation3 + $0x108] sm:$0xff] }
  0x4e   :  { %v1776_v61 = vmul.f32 0.120078385, %v1765_v15  ;;  %v248_v19 = vadd.f32 %v200_v14, %v104_v10  ;;  %v488_v43 = vmul.f32 0.23388076, %v440_v4  ;;  %v1065_v26 = vmul.f32 0.2920817, %v1725_v50 }
  0x4f   :  { %1448 = vst [vmem:[#allocation6 + $0x78] sm:$0xff] %v1400_v8  ;;  %v1257_v46 = vadd.f32 %v1112_v22, %v1763_v59  ;;  %v535_v31 = vadd.f32 %v487_v7, %v391_v20  ;;  %v105_v38 = vmul.f32 0.120078385, %v57_v21  ;;  %v201_v36 = vmul.f32 0.23388076, %v153_v18  ;;  %v154_v1 = vld [vmem:[#allocation3 + $0xf9] sm:$0xff] }
  0x50   :  { %v392_v32 = vadd.f32 %v344_v16, %v248_v19  ;;  %v924_v37 = vmul.f32 0.23388076, %v1749_v39  ;;  %v1113_v42 = vadd.f32 %v1065_v26, %v968_v29  ;;  %v345_v47 = vmul.f32 0.2920817, %v297_v34  ;;  %v298_v50 = vld [vmem:[#allocation3 + $0xfa] sm:$0xff]  ;;  %v155_v4 = vld [vmem:[#allocation3 + $0x109] sm:$0xff] }
  0x51   :  { %v1401_v40 = vadd.f32 %v1257_v46, %v1776_v61  ;;  %v969_v51 = vadd.f32 %v1746_v25, %v1701_v12  ;;  %v249_v44 = vadd.f32 %v201_v36, %v105_v38  ;;  %v489_v45 = vmul.f32 0.23388076, %v441_v30  ;;  %v585_v53 = vld [vmem:[#allocation3 + $0xf4] sm:$0xff]  ;;  %v299_v29 = vld [vmem:[#allocation3 + $0x10a] sm:$0xff] }
  0x52   :  { %v536_v5 = vadd.f32 %v488_v43, %v392_v32  ;;  %v632_v6 = vmul.f32 0.120078385, %v584_v33  ;;  %v1787_v35 = vmul.f32 0.120078385, %v1778_v24  ;;  %v1258_v52 = vadd.f32 %v1113_v42, %v924_v37  ;;  %v442_v9 = vld [vmem:[#allocation3 + $0xfb] sm:$0xff]  ;;  %v443_v14 = vld [vmem:[#allocation3 + $0x10b] sm:$0xff] }
  0x53   :  { %1449 = vst [vmem:[#allocation6 + $0x80] sm:$0xff] %v1401_v40  ;;  %v1789_v54 = vadd.f32 %v631_v48, %v535_v31  ;;  %v393_v55 = vadd.f32 %v345_v47, %v249_v44  ;;  %v1066_v57 = vmul.f32 0.2920817, %v1739_v27  ;;  %v106_v58 = vmul.f32 0.120078385, %v58_v2  ;;  %v60_v8 = vld [vmem:[#allocation3 + $0x110] sm:$0xff] }
  0x54   :  { %v970_v12 = vadd.f32 %v1759_v49, %v1721_v41  ;;  %v1402_v25 = vadd.f32 %v1258_v52, %v1787_v35  ;;  %v202_v62 = vmul.f32 0.23388076, %v154_v1  ;;  %v346_v28 = vmul.f32 0.2920817, %v298_v50  ;;  %v586_v49 = vld [vmem:[#allocation3 + $0xfc] sm:$0xff]  ;;  %v156_v26 = vld [vmem:[#allocation3 + $0x111] sm:$0xff] }
  0x55   :  { %v925_v63 = vmul.f32 0.23388076, %v1765_v15  ;;  %v537_v0 = vadd.f32 %v489_v45, %v393_v55  ;;  %v633_v23 = vmul.f32 0.120078385, %v585_v53  ;;  %v1114_v3 = vadd.f32 %v1066_v57, %v969_v51  ;;  %v300_v30 = vld [vmem:[#allocation3 + $0x112] sm:$0xff]  ;;  %v61_v51 = vld [vmem:[#allocation3 + $0x120] sm:$0xff] }
  0x56   :  { %v971_v27 = vadd.f32 %v1763_v59, %v1729_v56  ;;  %v1798_v7 = vadd.f32 %v632_v6, %v536_v5  ;;  %1450 = vst [vmem:[#allocation6 + $0x88] sm:$0xff] %v1402_v25  ;;  %v250_v10 = vadd.f32 %v202_v62, %v106_v58  ;;  %v490_v41 = vmul.f32 0.23388076, %v442_v9  ;;  %v587_v36 = vld [vmem:[#allocation3 + $0x10c] sm:$0xff]  ;;  %v588_v58 = vld [vmem:[#allocation3 + $0x114] sm:$0xff]  ;;  %v301_v9 = vld [vmem:[#allocation3 + $0x122] sm:$0xff] }
  0x57   :  { %v1801_v20 = vmul.f32 0.23388076, %v1778_v24  ;;  %v1804_v22 = vmul.f32 0.120078385, %v1789_v54  ;;  %v1259_v16 = vadd.f32 %v1114_v3, %v925_v63  ;;  %v1067_v21 = vmul.f32 0.2920817, %v1749_v39 }
  0x58   :  { %v394_v18 = vadd.f32 %v346_v28, %v250_v10  ;;  %v107_v48 = vmul.f32 0.120078385, %v59_v60  ;;  %v203_v56 = vmul.f32 0.23388076, %v155_v4  ;;  %v347_v59 = vmul.f32 0.2920817, %v299_v29 }
  0x59   :  { %v1807_v19 = vadd.f32 %v633_v23, %v537_v0  ;;  %v1403_v34 = vadd.f32 %v1259_v16, %v1804_v22  ;;  %v634_v46 = vmul.f32 0.120078385, %v586_v49  ;;  %v1115_v43 = vadd.f32 %v1067_v21, %v970_v12  ;;  %v444_v39 = vld [vmem:[#allocation3 + $0x113] sm:$0xff]  ;;  %v445_v3 = vld [vmem:[#allocation3 + $0x123] sm:$0xff] }
  0x5a   :  { %v538_v31 = vadd.f32 %v490_v41, %v394_v18  ;;  %v1811_v32 = vmul.f32 0.120078385, %v1798_v7  ;;  %v251_v33 = vadd.f32 %v203_v56, %v107_v48  ;;  %v491_v38 = vmul.f32 0.23388076, %v443_v14  ;;  %v62_v41 = vld [vmem:[#allocation3 + $0x128] sm:$0xff] }
  0x5b   :  { %v972_v40 = vadd.f32 %v924_v37, %v1737_v13  ;;  %1451 = vst [vmem:[#allocation6 + $0x90] sm:$0xff] %v1403_v34  ;;  %v1260_v42 = vadd.f32 %v1115_v43, %v1801_v20  ;;  %v1068_v47 = vmul.f32 0.2920817, %v1765_v15  ;;  %v108_v2 = vmul.f32 0.120078385, %v60_v8  ;;  %v157_v37 = vld [vmem:[#allocation3 + $0x121] sm:$0xff] }
  0x5c   :  { %v1817_v44 = vmul.f32 0.23388076, %v1789_v54  ;;  %v395_v45 = vadd.f32 %v347_v59, %v251_v33  ;;  %v204_v1 = vmul.f32 0.23388076, %v156_v26  ;;  %v348_v50 = vmul.f32 0.2920817, %v300_v30 }
  0x5d   :  { %v1404_v5 = vadd.f32 %v1260_v42, %v1811_v32  ;;  %v635_v6 = vmul.f32 0.120078385, %v587_v36  ;;  %v1821_v52 = vmul.f32 0.120078385, %v1807_v19  ;;  %v1116_v13 = vadd.f32 %v1068_v47, %v971_v27  ;;  %v589_v18 = vld [vmem:[#allocation3 + $0x124] sm:$0xff]  ;;  %v63_v26 = vld [vmem:[#allocation3 + $0x138] sm:$0xff] }
  0x5e   :  { %v1823_v53 = vadd.f32 %v634_v46, %v538_v31  ;;  %v539_v55 = vadd.f32 %v491_v38, %v395_v45  ;;  %v252_v15 = vadd.f32 %v204_v1, %v108_v2  ;;  %v492_v57 = vmul.f32 0.23388076, %v444_v39  ;;  %v446_v43 = vld [vmem:[#allocation3 + $0x12b] sm:$0xff]  ;;  %v159_v36 = vld [vmem:[#allocation3 + $0x139] sm:$0xff] }
  0x5f   :  { %1452 = vst [vmem:[#allocation6 + $0x98] sm:$0xff] %v1404_v5  ;;  %v1261_v12 = vadd.f32 %v1116_v13, %v1817_v44  ;;  %v1069_v25 = vmul.f32 0.2920817, %v1778_v24  ;;  %v109_v62 = vmul.f32 0.120078385, %v61_v51  ;;  %v973_v28 = vadd.f32 %v925_v63, %v1752_v11  ;;  %v158_v11 = vld [vmem:[#allocation3 + $0x129] sm:$0xff] }
  0x60   :  { %v1829_v60 = vmul.f32 0.23388076, %v1798_v7  ;;  %v396_v0 = vadd.f32 %v348_v50, %v252_v15  ;;  %v205_v23 = vmul.f32 0.23388076, %v157_v37  ;;  %v636_v29 = vmul.f32 0.120078385, %v588_v58 }
  0x61   :  { %v1405_v4 = vadd.f32 %v1261_v12, %v1821_v52  ;;  %v1117_v27 = vadd.f32 %v1069_v25, %v972_v40  ;;  %v349_v10 = vmul.f32 0.2920817, %v301_v9  ;;  %v1832_v49 = vadd.f32 %v635_v6, %v539_v55  ;;  %v302_v63 = vld [vmem:[#allocation3 + $0x12a] sm:$0xff]  ;;  %v303_v39 = vld [vmem:[#allocation3 + $0x13a] sm:$0xff] }
  0x62   :  { %v540_v14 = vadd.f32 %v492_v57, %v396_v0  ;;  %v1835_v24 = vmul.f32 0.120078385, %v1823_v53  ;;  %v253_v8 = vadd.f32 %v205_v23, %v109_v62  ;;  %v493_v21 = vmul.f32 0.23388076, %v445_v3  ;;  %v590_v51 = vld [vmem:[#allocation3 + $0x12c] sm:$0xff]  ;;  %v447_v1 = vld [vmem:[#allocation3 + $0x13b] sm:$0xff] }
  0x63   :  { %1453 = vst [vmem:[#allocation6 + $0xa0] sm:$0xff] %v1405_v4  ;;  %v1262_v16 = vadd.f32 %v1117_v27, %v1829_v60  ;;  %v1070_v48 = vmul.f32 0.2920817, %v1789_v54  ;;  %v974_v56 = vadd.f32 %v1801_v20, %v1768_v17  ;;  %v1842_v59 = vmul.f32 0.23388076, %v1807_v19  ;;  %v64_v58 = vld [vmem:[#allocation3 + $0x140] sm:$0xff] }
  0x64   :  { %v397_v34 = vadd.f32 %v349_v10, %v253_v8  ;;  %v110_v46 = vmul.f32 0.120078385, %v62_v41  ;;  %v206_v33 = vmul.f32 0.23388076, %v158_v11  ;;  %v350_v38 = vmul.f32 0.2920817, %v302_v63 }
  0x65   :  { %v1406_v30 = vadd.f32 %v1262_v16, %v1835_v24  ;;  %v1118_v31 = vadd.f32 %v1070_v48, %v973_v28  ;;  %v930_v40 = vmul.f32 0.23388076, %v1823_v53  ;;  %v1846_v54 = vadd.f32 %v636_v29, %v540_v14  ;;  %v160_v9 = vld [vmem:[#allocation3 + $0x141] sm:$0xff]  ;;  %v65_v63 = vld [vmem:[#allocation3 + $0x150] sm:$0xff] }
  0x66   :  { %v637_v42 = vmul.f32 0.120078385, %v589_v18  ;;  %v1849_v17 = vmul.f32 0.120078385, %v1832_v49  ;;  %v541_v20 = vadd.f32 %v493_v21, %v397_v34  ;;  %v254_v2 = vadd.f32 %v206_v33, %v110_v46  ;;  %v591_v0 = vld [vmem:[#allocation3 + $0x13c] sm:$0xff]  ;;  %v161_v48 = vld [vmem:[#allocation3 + $0x151] sm:$0xff] }
  0x67   :  { %1454 = vst [vmem:[#allocation6 + $0xa8] sm:$0xff] %v1406_v30  ;;  %v1263_v47 = vadd.f32 %v1118_v31, %v1842_v59  ;;  %v1071_v45 = vmul.f32 0.2920817, %v1798_v7  ;;  %v975_v50 = vadd.f32 %v1817_v44, %v1776_v61  ;;  %v494_v5 = vmul.f32 0.23388076, %v446_v43  ;;  %v304_v7 = vld [vmem:[#allocation3 + $0x142] sm:$0xff] }
  0x68   :  { %v111_v6 = vmul.f32 0.120078385, %v63_v26  ;;  %v207_v13 = vmul.f32 0.23388076, %v159_v36  ;;  %v398_v55 = vadd.f32 %v350_v38, %v254_v2  ;;  %v351_v57 = vmul.f32 0.2920817, %v303_v39 }
  0x69   :  { %v1407_v37 = vadd.f32 %v1263_v47, %v1849_v17  ;;  %v1119_v15 = vadd.f32 %v1071_v45, %v974_v56  ;;  %v638_v12 = vmul.f32 0.120078385, %v590_v51  ;;  %v1857_v25 = vmul.f32 0.120078385, %v1846_v54  ;;  %v448_v10 = vld [vmem:[#allocation3 + $0x143] sm:$0xff]  ;;  %v305_v56 = vld [vmem:[#allocation3 + $0x152] sm:$0xff] }
  0x6a   :  { %v255_v62 = vadd.f32 %v207_v13, %v111_v6  ;;  %v1859_v28 = vadd.f32 %v637_v42, %v541_v20  ;;  %v495_v44 = vmul.f32 0.23388076, %v447_v1  ;;  %v1072_v23 = vmul.f32 0.2920817, %v1807_v19  ;;  %v592_v31 = vld [vmem:[#allocation3 + $0x144] sm:$0xff]  ;;  %v449_v42 = vld [vmem:[#allocation3 + $0x153] sm:$0xff] }
  0x6b   :  { %1455 = vst [vmem:[#allocation6 + $0xb0] sm:$0xff] %v1407_v37  ;;  %v1264_v61 = vadd.f32 %v1119_v15, %v930_v40  ;;  %v542_v3 = vadd.f32 %v494_v5, %v398_v55  ;;  %v112_v29 = vmul.f32 0.120078385, %v64_v58  ;;  %v208_v27 = vmul.f32 0.23388076, %v160_v9  ;;  %v66_v45 = vld [vmem:[#allocation3 + $0x158] sm:$0xff] }
  0x6c   :  { %v399_v4 = vadd.f32 %v351_v57, %v255_v62  ;;  %v931_v41 = vmul.f32 0.23388076, %v1832_v49  ;;  %v1120_v8 = vadd.f32 %v1072_v23, %v975_v50  ;;  %v352_v11 = vmul.f32 0.2920817, %v304_v7  ;;  %v162_v1 = vld [vmem:[#allocation3 + $0x159] sm:$0xff]  ;;  %v67_v37 = vld [vmem:[#allocation3 + $0x168] sm:$0xff] }
  0x6d   :  { %v1408_v14 = vadd.f32 %v1264_v61, %v1857_v25  ;;  %v976_v16 = vadd.f32 %v1829_v60, %v1787_v35  ;;  %v639_v21 = vmul.f32 0.120078385, %v591_v0  ;;  %v256_v18 = vadd.f32 %v208_v27, %v112_v29  ;;  %v593_v6 = vld [vmem:[#allocation3 + $0x154] sm:$0xff]  ;;  %v307_v0 = vld [vmem:[#allocation3 + $0x16a] sm:$0xff] }
  0x6e   :  { %v543_v19 = vadd.f32 %v495_v44, %v399_v4  ;;  %v1867_v34 = vmul.f32 0.120078385, %v1859_v28  ;;  %v1265_v46 = vadd.f32 %v1120_v8, %v931_v41  ;;  %v496_v43 = vmul.f32 0.23388076, %v448_v10  ;;  %v450_v13 = vld [vmem:[#allocation3 + $0x15b] sm:$0xff]  ;;  %v163_v44 = vld [vmem:[#allocation3 + $0x169] sm:$0xff] }
  0x6f   :  { %1456 = vst [vmem:[#allocation6 + $0xb8] sm:$0xff] %v1408_v14  ;;  %v1869_v26 = vadd.f32 %v638_v12, %v542_v3  ;;  %v400_v30 = vadd.f32 %v352_v11, %v256_v18  ;;  %v1073_v33 = vmul.f32 0.2920817, %v1823_v53  ;;  %v113_v38 = vmul.f32 0.120078385, %v65_v63  ;;  %v306_v53 = vld [vmem:[#allocation3 + $0x15a] sm:$0xff] }
  0x70   :  { %v977_v35 = vadd.f32 %v1842_v59, %v1804_v22  ;;  %v1409_v60 = vadd.f32 %v1265_v46, %v1867_v34  ;;  %v209_v36 = vmul.f32 0.23388076, %v161_v48  ;;  %v353_v39 = vmul.f32 0.2920817, %v305_v56  ;;  %v451_v8 = vld [vmem:[#allocation3 + $0x16b] sm:$0xff] }
  0x71   :  { %v978_v20 = vadd.f32 %v930_v40, %v1811_v32  ;;  %v1877_v47 = vadd.f32 %v931_v41, %v1821_v52  ;;  %v932_v2 = vmul.f32 0.23388076, %v1846_v54  ;;  %v1121_v51 = vadd.f32 %v1073_v33, %v976_v16  ;;  %v68_v18 = vld [vmem:[#allocation3 + $0x170] sm:$0xff] }
  0x72   :  { %v1880_v50 = vadd.f32 %v639_v21, %v543_v19  ;;  %1457 = vst [vmem:[#allocation6 + $0xc0] sm:$0xff] %v1409_v60  ;;  %v544_v22 = vadd.f32 %v496_v43, %v400_v30  ;;  %v640_v59 = vmul.f32 0.120078385, %v592_v31  ;;  %v257_v5 = vadd.f32 %v209_v36, %v113_v38  ;;  %v164_v43 = vld [vmem:[#allocation3 + $0x171] sm:$0xff] }
  0x73   :  { %v1883_v32 = vmul.f32 0.120078385, %v1869_v26  ;;  %v1266_v52 = vadd.f32 %v1121_v51, %v932_v2  ;;  %v497_v40 = vmul.f32 0.23388076, %v449_v42  ;;  %v1074_v55 = vmul.f32 0.2920817, %v1832_v49 }
  0x74   :  { %v401_v15 = vadd.f32 %v353_v39, %v257_v5  ;;  %v114_v57 = vmul.f32 0.120078385, %v66_v45  ;;  %v210_v58 = vmul.f32 0.23388076, %v162_v1  ;;  %v354_v9 = vmul.f32 0.2920817, %v306_v53 }
  0x75   :  { %v933_v12 = vmul.f32 0.23388076, %v1859_v28  ;;  %v1410_v62 = vadd.f32 %v1266_v52, %v1883_v32  ;;  %v641_v7 = vmul.f32 0.120078385, %v593_v6  ;;  %v1122_v61 = vadd.f32 %v1074_v55, %v977_v35  ;;  %v594_v49 = vld [vmem:[#allocation3 + $0x15c] sm:$0xff]  ;;  %v595_v38 = vld [vmem:[#allocation3 + $0x16c] sm:$0xff] }
  0x76   :  { %v1888_v23 = vadd.f32 %v640_v59, %v544_v22  ;;  %v1891_v3 = vmul.f32 0.120078385, %v1880_v50  ;;  %v258_v4 = vadd.f32 %v210_v58, %v114_v57  ;;  %v498_v29 = vmul.f32 0.23388076, %v450_v13  ;;  %v308_v35 = vld [vmem:[#allocation3 + $0x172] sm:$0xff]  ;;  %v69_v5 = vld [vmem:[#allocation3 + $0x180] sm:$0xff] }
  0x77   :  { %1458 = vst [vmem:[#allocation6 + $0xc8] sm:$0xff] %v1410_v62  ;;  %v545_v27 = vadd.f32 %v497_v40, %v401_v15  ;;  %v1267_v10 = vadd.f32 %v1122_v61, %v933_v12  ;;  %v1075_v41 = vmul.f32 0.2920817, %v1846_v54  ;;  %v115_v14 = vmul.f32 0.120078385, %v67_v37  ;;  %v452_v42 = vld [vmem:[#allocation3 + $0x173] sm:$0xff] }
  0x78   :  { %v980_v11 = vadd.f32 %v932_v2, %v1835_v24  ;;  %v402_v63 = vadd.f32 %v354_v9, %v258_v4  ;;  %v211_v16 = vmul.f32 0.23388076, %v163_v44  ;;  %v355_v21 = vmul.f32 0.2920817, %v307_v0  ;;  %v165_v52 = vld [vmem:[#allocation3 + $0x181] sm:$0xff]  ;;  %v596_v57 = vld [vmem:[#allocation3 + $0x174] sm:$0xff] }
  0x79   :  { %v934_v48 = vmul.f32 0.23388076, %v1869_v26  ;;  %v1411_v56 = vadd.f32 %v1267_v10, %v1891_v3  ;;  %v642_v19 = vmul.f32 0.120078385, %v594_v49  ;;  %v1123_v46 = vadd.f32 %v1075_v41, %v978_v20  ;;  %v309_v40 = vld [vmem:[#allocation3 + $0x182] sm:$0xff]  ;;  %v310_v41 = vld [vmem:[#allocation3 + $0x18a] sm:$0xff] }
  0x7a   :  { %v546_v30 = vadd.f32 %v498_v29, %v402_v63  ;;  %v1898_v31 = vmul.f32 0.120078385, %v1888_v23  ;;  %v259_v54 = vadd.f32 %v211_v16, %v115_v14  ;;  %v499_v33 = vmul.f32 0.23388076, %v451_v8  ;;  %v70_v4 = vld [vmem:[#allocation3 + $0x188] sm:$0xff] }
  0x7b   :  { %v1900_v24 = vadd.f32 %v641_v7, %v545_v27  ;;  %1459 = vst [vmem:[#allocation6 + $0xd0] sm:$0xff] %v1411_v56  ;;  %v1268_v60 = vadd.f32 %v1123_v46, %v934_v48  ;;  %v1076_v36 = vmul.f32 0.2920817, %v1859_v28  ;;  %v116_v39 = vmul.f32 0.120078385, %v68_v18  ;;  %v453_v7 = vld [vmem:[#allocation3 + $0x183] sm:$0xff] }
  0x7c   :  { %v981_v2 = vadd.f32 %v933_v12, %v1849_v17  ;;  %v935_v20 = vmul.f32 0.23388076, %v1880_v50  ;;  %v403_v51 = vadd.f32 %v355_v21, %v259_v54  ;;  %v212_v45 = vmul.f32 0.23388076, %v164_v43  ;;  %v166_v29 = vld [vmem:[#allocation3 + $0x189] sm:$0xff]  ;;  %v71_v54 = vld [vmem:[#allocation3 + $0x198] sm:$0xff] }
  0x7d   :  { %v1412_v1 = vadd.f32 %v1268_v60, %v1898_v31  ;;  %v643_v53 = vmul.f32 0.120078385, %v595_v38  ;;  %v1124_v22 = vadd.f32 %v1076_v36, %v1877_v47  ;;  %v356_v59 = vmul.f32 0.2920817, %v308_v35  ;;  %v311_v38 = vld [vmem:[#allocation3 + $0x19a] sm:$0xff] }
  0x7e   :  { %v1907_v6 = vadd.f32 %v642_v19, %v546_v30  ;;  %v547_v13 = vadd.f32 %v499_v33, %v403_v51  ;;  %v260_v37 = vadd.f32 %v212_v45, %v116_v39  ;;  %v500_v28 = vmul.f32 0.23388076, %v452_v42  ;;  %v167_v33 = vld [vmem:[#allocation3 + $0x199] sm:$0xff] }
  0x7f   :  { %v982_v17 = vadd.f32 %v934_v48, %v1857_v25  ;;  %1460 = vst [vmem:[#allocation6 + $0xd8] sm:$0xff] %v1412_v1  ;;  %v1911_v55 = vmul.f32 0.120078385, %v1900_v24  ;;  %v1269_v15 = vadd.f32 %v1124_v22, %v935_v20  ;;  %v1077_v58 = vmul.f32 0.2920817, %v1869_v26  ;;  %v455_v45 = vld [vmem:[#allocation3 + $0x19b] sm:$0xff] }
  0x80   :  { %v1915_v47 = vadd.f32 %v935_v20, %v1867_v34  ;;  %v936_v9 = vmul.f32 0.23388076, %v1888_v23  ;;  %v404_v12 = vadd.f32 %v356_v59, %v260_v37  ;;  %v117_v62 = vmul.f32 0.120078385, %v69_v5  ;;  %v597_v34 = vld [vmem:[#allocation3 + $0x184] sm:$0xff]  ;;  %v598_v20 = vld [vmem:[#allocation3 + $0x18c] sm:$0xff] }
  0x81   :  { %v1413_v61 = vadd.f32 %v1269_v15, %v1911_v55  ;;  %v1125_v44 = vadd.f32 %v1077_v58, %v980_v11  ;;  %v213_v25 = vmul.f32 0.23388076, %v165_v52  ;;  %v357_v0 = vmul.f32 0.2920817, %v309_v40  ;;  %v454_v11 = vld [vmem:[#allocation3 + $0x18b] sm:$0xff]  ;;  %v168_v58 = vld [vmem:[#allocation3 + $0x1a1] sm:$0xff] }
  0x82   :  { %v1919_v49 = vadd.f32 %v643_v53, %v547_v13  ;;  %v548_v27 = vadd.f32 %v500_v28, %v404_v12  ;;  %v644_v10 = vmul.f32 0.120078385, %v596_v57  ;;  %v1922_v26 = vmul.f32 0.120078385, %v1907_v6  ;;  %v72_v28 = vld [vmem:[#allocation3 + $0x1a0] sm:$0xff] }
  0x83   :  { %1461 = vst [vmem:[#allocation6 + $0xe0] sm:$0xff] %v1413_v61  ;;  %v1270_v14 = vadd.f32 %v1125_v44, %v936_v9  ;;  %v261_v8 = vadd.f32 %v213_v25, %v117_v62  ;;  %v501_v63 = vmul.f32 0.23388076, %v453_v7  ;;  %v1078_v16 = vmul.f32 0.2920817, %v1880_v50  ;;  %v599_v7 = vld [vmem:[#allocation3 + $0x19c] sm:$0xff] }
  0x84   :  { %v1926_v21 = vadd.f32 %v936_v9, %v1883_v32  ;;  %v937_v18 = vmul.f32 0.23388076, %v1900_v24  ;;  %v118_v48 = vmul.f32 0.120078385, %v70_v4  ;;  %v214_v56 = vmul.f32 0.23388076, %v166_v29 }
  0x85   :  { %v1414_v19 = vadd.f32 %v1270_v14, %v1922_v26  ;;  %v405_v46 = vadd.f32 %v357_v0, %v261_v8  ;;  %v1126_v43 = vadd.f32 %v1078_v16, %v981_v2  ;;  %v358_v30 = vmul.f32 0.2920817, %v310_v41  ;;  %v456_v0 = vld [vmem:[#allocation3 + $0x1a3] sm:$0xff]  ;;  %v73_v29 = vld [vmem:[#allocation3 + $0x1b0] sm:$0xff] }
  0x86   :  { %v645_v35 = vmul.f32 0.120078385, %v597_v34  ;;  %v1931_v60 = vmul.f32 0.120078385, %v1919_v49  ;;  %v262_v50 = vadd.f32 %v214_v56, %v118_v48  ;;  %v502_v36 = vmul.f32 0.23388076, %v454_v11 }
  0x87   :  { %v1933_v32 = vadd.f32 %v644_v10, %v548_v27  ;;  %1462 = vst [vmem:[#allocation6 + $0xe8] sm:$0xff] %v1414_v19  ;;  %v549_v39 = vadd.f32 %v501_v63, %v405_v46  ;;  %v1271_v42 = vadd.f32 %v1126_v43, %v937_v18  ;;  %v1079_v51 = vmul.f32 0.2920817, %v1888_v23  ;;  %v312_v23 = vld [vmem:[#allocation3 + $0x1a2] sm:$0xff]  ;;  %v169_v16 = vld [vmem:[#allocation3 + $0x1b1] sm:$0xff] }
  0x88   :  { %v938_v2 = vmul.f32 0.23388076, %v1907_v6  ;;  %v406_v1 = vadd.f32 %v358_v30, %v262_v50  ;;  %v119_v53 = vmul.f32 0.120078385, %v71_v54  ;;  %v215_v22 = vmul.f32 0.23388076, %v167_v33 }
  0x89   :  { %v1938_v59 = vadd.f32 %v937_v18, %v1891_v3  ;;  %v1415_v5 = vadd.f32 %v1271_v42, %v1931_v60  ;;  %v1127_v13 = vadd.f32 %v1079_v51, %v982_v17  ;;  %v359_v37 = vmul.f32 0.2920817, %v311_v38  ;;  %v600_v4 = vld [vmem:[#allocation3 + $0x1a4] sm:$0xff]  ;;  %v313_v11 = vld [vmem:[#allocation3 + $0x1b2] sm:$0xff] }
  0x8a   :  { %v550_v52 = vadd.f32 %v502_v36, %v406_v1  ;;  %v646_v40 = vmul.f32 0.120078385, %v598_v20  ;;  %v263_v15 = vadd.f32 %v215_v22, %v119_v53  ;;  %v503_v57 = vmul.f32 0.23388076, %v455_v45  ;;  %v457_v18 = vld [vmem:[#allocation3 + $0x1b3] sm:$0xff] }
  0x8b   :  { %v939_v9 = vmul.f32 0.23388076, %v1919_v49  ;;  %v1942_v12 = vadd.f32 %v645_v35, %v549_v39  ;;  %1463 = vst [vmem:[#allocation6 + $0xf0] sm:$0xff] %v1415_v5  ;;  %v1945_v62 = vmul.f32 0.120078385, %v1933_v32  ;;  %v1272_v3 = vadd.f32 %v1127_v13, %v938_v2  ;;  %v601_v46 = vld [vmem:[#allocation3 + $0x1b4] sm:$0xff] }
  0x8c   :  { %v1948_v17 = vadd.f32 %v938_v2, %v1898_v31  ;;  %v407_v61 = vadd.f32 %v359_v37, %v263_v15  ;;  %v1080_v44 = vmul.f32 0.2920817, %v1900_v24  ;;  %v120_v25 = vmul.f32 0.120078385, %v72_v28  ;;  %v74_v43 = vld [vmem:[#allocation3 + $0x1b8] sm:$0xff] }
  0x8d   :  { %v940_v27 = vmul.f32 0.23388076, %v1933_v32  ;;  %v1416_v10 = vadd.f32 %v1272_v3, %v1945_v62  ;;  %v216_v34 = vmul.f32 0.23388076, %v168_v58  ;;  %v360_v41 = vmul.f32 0.2920817, %v312_v23 }
  0x8e   :  { %v1953_v14 = vadd.f32 %v646_v40, %v550_v52  ;;  %v551_v8 = vadd.f32 %v503_v57, %v407_v61  ;;  %v647_v63 = vmul.f32 0.120078385, %v599_v7  ;;  %v1128_v31 = vadd.f32 %v1080_v44, %v1915_v47  ;;  %v170_v51 = vld [vmem:[#allocation3 + $0x1b9] sm:$0xff]  ;;  %v75_v57 = vld [vmem:[#allocation3 + $0x1c8] sm:$0xff] }
  0x8f   :  { %v1957_v24 = vadd.f32 %v939_v9, %v1911_v55  ;;  %v941_v48 = vmul.f32 0.23388076, %v1942_v12  ;;  %1464 = vst [vmem:[#allocation6 + $0xf8] sm:$0xff] %v1416_v10  ;;  %v264_v56 = vadd.f32 %v216_v34, %v120_v25  ;;  %v504_v19 = vmul.f32 0.23388076, %v456_v0  ;;  %v314_v45 = vld [vmem:[#allocation3 + $0x1ba] sm:$0xff] }
  0x90   :  { %v846_v30 = vmul.f32 0.120078385, %v1942_v12  ;;  %v1273_v54 = vadd.f32 %v1128_v31, %v939_v9  ;;  %v648_v33 = vmul.f32 0.120078385, %v600_v4  ;;  %v1081_v38 = vmul.f32 0.2920817, %v1907_v6 }
  0x91   :  { %v408_v47 = vadd.f32 %v360_v41, %v264_v56  ;;  %v121_v35 = vmul.f32 0.120078385, %v73_v29  ;;  %v217_v50 = vmul.f32 0.23388076, %v169_v16  ;;  %v361_v36 = vmul.f32 0.2920817, %v313_v11 }
  0x92   :  { %v1962_v39 = vadd.f32 %v647_v63, %v551_v8  ;;  %v1417_v55 = vadd.f32 %v1273_v54, %v846_v30  ;;  %v847_v42 = vmul.f32 0.120078385, %v1953_v14  ;;  %v1129_v20 = vadd.f32 %v1081_v38, %v1926_v21  ;;  %v458_v28 = vld [vmem:[#allocation3 + $0x1bb] sm:$0xff]  ;;  %v171_v3 = vld [vmem:[#allocation3 + $0x1c9] sm:$0xff] }
  0x93   :  { %v552_v2 = vadd.f32 %v504_v19, %v408_v47  ;;  %v265_v1 = vadd.f32 %v217_v50, %v121_v35  ;;  %v505_v53 = vmul.f32 0.23388076, %v457_v18  ;;  %v649_v22 = vmul.f32 0.120078385, %v601_v46  ;;  %v602_v25 = vld [vmem:[#allocation3 + $0x1bc] sm:$0xff]  ;;  %v315_v0 = vld [vmem:[#allocation3 + $0x1ca] sm:$0xff] }
  0x94   :  { %v1967_v5 = vadd.f32 %v940_v27, %v1922_v26  ;;  %1465 = vst [vmem:[#allocation6 + $0x100] sm:$0xff] %v1417_v55  ;;  %v1274_v6 = vadd.f32 %v1129_v20, %v940_v27  ;;  %v1082_v13 = vmul.f32 0.2920817, %v1919_v49  ;;  %v122_v37 = vmul.f32 0.120078385, %v74_v43  ;;  %v459_v34 = vld [vmem:[#allocation3 + $0x1cb] sm:$0xff] }
  0x95   :  { %v1970_v52 = vadd.f32 %v648_v33, %v552_v2  ;;  %v409_v40 = vadd.f32 %v361_v36, %v265_v1  ;;  %v218_v15 = vmul.f32 0.23388076, %v170_v51  ;;  %v362_v21 = vmul.f32 0.2920817, %v314_v45  ;;  %v76_v18 = vld [vmem:[#allocation3 + $0x1d0] sm:$0xff]  ;;  %v77_v20 = vld [vmem:[#allocation3 + $0x1e0] sm:$0xff] }
  0x96   :  { %v942_v58 = vmul.f32 0.23388076, %v1953_v14  ;;  %v943_v23 = vmul.f32 0.23388076, %v1962_v39  ;;  %v1418_v9 = vadd.f32 %v1274_v6, %v847_v42  ;;  %v1130_v26 = vadd.f32 %v1082_v13, %v1938_v59  ;;  %v172_v46 = vld [vmem:[#allocation3 + $0x1d1] sm:$0xff]  ;;  %v317_v13 = vld [vmem:[#allocation3 + $0x1e2] sm:$0xff] }
  0x97   :  { %v553_v7 = vadd.f32 %v505_v53, %v409_v40  ;;  %v848_v61 = vmul.f32 0.120078385, %v1962_v39  ;;  %v266_v49 = vadd.f32 %v218_v15, %v122_v37  ;;  %v506_v44 = vmul.f32 0.23388076, %v458_v28  ;;  %v316_v43 = vld [vmem:[#allocation3 + $0x1d2] sm:$0xff]  ;;  %v173_v53 = vld [vmem:[#allocation3 + $0x1e1] sm:$0xff] }
  0x98   :  { %v1977_v4 = vadd.f32 %v941_v48, %v1931_v60  ;;  %1466 = vst [vmem:[#allocation6 + $0x108] sm:$0xff] %v1418_v9  ;;  %v1275_v29 = vadd.f32 %v1130_v26, %v941_v48  ;;  %v1083_v27 = vmul.f32 0.2920817, %v1933_v32  ;;  %v123_v10 = vmul.f32 0.120078385, %v75_v57  ;;  %v460_v55 = vld [vmem:[#allocation3 + $0x1d3] sm:$0xff] }
  0x99   :  { %v1981_v41 = vmul.f32 0.23388076, %v1970_v52  ;;  %v1983_v59 = vadd.f32 %v649_v22, %v553_v7  ;;  %v410_v8 = vadd.f32 %v362_v21, %v266_v49  ;;  %v219_v63 = vmul.f32 0.23388076, %v171_v3  ;;  %v604_v1 = vld [vmem:[#allocation3 + $0x1d4] sm:$0xff]  ;;  %v461_v21 = vld [vmem:[#allocation3 + $0x1e3] sm:$0xff] }
  0x9a   :  { %v1986_v31 = vadd.f32 %v942_v58, %v1945_v62  ;;  %v1419_v16 = vadd.f32 %v1275_v29, %v848_v61  ;;  %v1131_v60 = vadd.f32 %v1083_v27, %v1948_v17  ;;  %v363_v11 = vmul.f32 0.2920817, %v315_v0  ;;  %v603_v62 = vld [vmem:[#allocation3 + $0x1cc] sm:$0xff] }
  0x9b   :  { %v554_v48 = vadd.f32 %v506_v44, %v410_v8  ;;  %v650_v56 = vmul.f32 0.120078385, %v602_v25  ;;  %v267_v32 = vadd.f32 %v219_v63, %v123_v10  ;;  %v507_v19 = vmul.f32 0.23388076, %v459_v34  ;;  %v605_v44 = vld [vmem:[#allocation3 + $0x1e4] sm:$0xff] }
  0x9c   :  { %v1989_v54 = vadd.f32 %v943_v23, %v846_v30  ;;  %1467 = vst [vmem:[#allocation6 + $0x110] sm:$0xff] %v1419_v16  ;;  %v1992_v33 = vmul.f32 0.120078385, %v1970_v52  ;;  %v1276_v38 = vadd.f32 %v1131_v60, %v942_v58  ;;  %v1084_v47 = vmul.f32 0.2920817, %v1942_v12  ;;  %v78_v25 = vld [vmem:[#allocation3 + $0x1e8] sm:$0xff] }
  0x9d   :  { %v1996_v17 = vadd.f32 %v1981_v41, %v847_v42  ;;  %v945_v35 = vmul.f32 0.23388076, %v1983_v59  ;;  %v411_v50 = vadd.f32 %v363_v11, %v267_v32  ;;  %v124_v36 = vmul.f32 0.120078385, %v76_v18  ;;  %v174_v0 = vld [vmem:[#allocation3 + $0x1e9] sm:$0xff] }
  0x9e   :  { %v1420_v30 = vadd.f32 %v1276_v38, %v1992_v33  ;;  %v1132_v51 = vadd.f32 %v1084_v47, %v1957_v24  ;;  %v220_v45 = vmul.f32 0.23388076, %v172_v46  ;;  %v364_v2 = vmul.f32 0.2920817, %v316_v43  ;;  %v318_v10 = vld [vmem:[#allocation3 + $0x1ea] sm:$0xff] }
  0x9f   :  { %v698_v22 = vadd.f32 %v650_v56, %v554_v48  ;;  %v555_v6 = vadd.f32 %v507_v19, %v411_v50  ;;  %v651_v12 = vmul.f32 0.120078385, %v603_v62  ;;  %v2002_v42 = vmul.f32 0.120078385, %v1983_v59 }
  0xa0   :  { %1468 = vst [vmem:[#allocation6 + $0x118] sm:$0xff] %v1420_v30  ;;  %v1277_v37 = vadd.f32 %v1132_v51, %v943_v23  ;;  %v268_v28 = vadd.f32 %v220_v45, %v124_v36  ;;  %v508_v40 = vmul.f32 0.23388076, %v460_v55  ;;  %v1085_v15 = vmul.f32 0.2920817, %v1953_v14  ;;  %v175_v45 = vld [vmem:[#allocation3 + $0x1f9] sm:$0xff] }
  0xa1   :  { %v2005_v57 = vadd.f32 %v945_v35, %v848_v61  ;;  %v652_v24 = vmul.f32 0.120078385, %v604_v1  ;;  %v125_v58 = vmul.f32 0.120078385, %v77_v20  ;;  %v221_v9 = vmul.f32 0.23388076, %v173_v53 }
  0xa2   :  { %v1421_v26 = vadd.f32 %v1277_v37, %v2002_v42  ;;  %v412_v3 = vadd.f32 %v364_v2, %v268_v28  ;;  %v1133_v7 = vadd.f32 %v1085_v15, %v1967_v5  ;;  %v365_v49 = vmul.f32 0.2920817, %v317_v13  ;;  %v462_v61 = vld [vmem:[#allocation3 + $0x1eb] sm:$0xff]  ;;  %v319_v37 = vld [vmem:[#allocation3 + $0x1fa] sm:$0xff] }
  0xa3   :  { %v946_v23 = vmul.f32 0.23388076, %v698_v22  ;;  %v2009_v29 = vadd.f32 %v651_v12, %v555_v6  ;;  %v269_v27 = vadd.f32 %v221_v9, %v125_v58  ;;  %v509_v14 = vmul.f32 0.23388076, %v461_v21  ;;  %v606_v5 = vld [vmem:[#allocation3 + $0x1ec] sm:$0xff]  ;;  %v463_v28 = vld [vmem:[#allocation3 + $0x1fb] sm:$0xff] }
  0xa4   :  { %1469 = vst [vmem:[#allocation6 + $0x120] sm:$0xff] %v1421_v26  ;;  %v556_v34 = vadd.f32 %v508_v40, %v412_v3  ;;  %v2011_v8 = vmul.f32 0.120078385, %v698_v22  ;;  %v1278_v63 = vadd.f32 %v1133_v7, %v1981_v41  ;;  %v1086_v16 = vmul.f32 0.2920817, %v1962_v39  ;;  %v79_v41 = vld [vmem:[#allocation3 + $0x1f8] sm:$0xff] }
  0xa5   :  { %v413_v60 = vadd.f32 %v365_v49, %v269_v27  ;;  %v653_v11 = vmul.f32 0.120078385, %v605_v44  ;;  %v126_v18 = vmul.f32 0.120078385, %v78_v25  ;;  %v222_v48 = vmul.f32 0.23388076, %v174_v0 }
  0xa6   :  { %v2015_v56 = vadd.f32 %v652_v24, %v556_v34  ;;  %v1422_v32 = vadd.f32 %v1278_v63, %v2011_v8  ;;  %v1134_v19 = vadd.f32 %v1086_v16, %v1977_v4  ;;  %v366_v46 = vmul.f32 0.2920817, %v318_v10  ;;  %v80_v15 = vld [vmem:[#allocation3 + $0x200] sm:$0xff]  ;;  %v81_v25 = vld [vmem:[#allocation3 + $0x210] sm:$0xff] }
  0xa7   :  { %v947_v43 = vmul.f32 0.23388076, %v2009_v29  ;;  %v557_v38 = vadd.f32 %v509_v14, %v413_v60  ;;  %v270_v62 = vadd.f32 %v222_v48, %v126_v18  ;;  %v510_v47 = vmul.f32 0.23388076, %v462_v61  ;;  %v607_v9 = vld [vmem:[#allocation3 + $0x1fc] sm:$0xff]  ;;  %v608_v10 = vld [vmem:[#allocation3 + $0x204] sm:$0xff] }
  0xa8   :  { %v2021_v39 = vadd.f32 %v946_v23, %v1992_v33  ;;  %1470 = vst [vmem:[#allocation6 + $0x128] sm:$0xff] %v1422_v32  ;;  %v852_v50 = vmul.f32 0.120078385, %v2009_v29  ;;  %v1279_v36 = vadd.f32 %v1134_v19, %v945_v35  ;;  %v654_v55 = vmul.f32 0.120078385, %v606_v5  ;;  %v320_v26 = vld [vmem:[#allocation3 + $0x202] sm:$0xff] }
  0xa9   :  { %v2024_v20 = vadd.f32 %v653_v11, %v557_v38  ;;  %v414_v30 = vadd.f32 %v366_v46, %v270_v62  ;;  %v1087_v4 = vmul.f32 0.2920817, %v1970_v52  ;;  %v1088_v51 = vmul.f32 0.2920817, %v1983_v59  ;;  %v464_v44 = vld [vmem:[#allocation3 + $0x203] sm:$0xff]  ;;  %v321_v61 = vld [vmem:[#allocation3 + $0x212] sm:$0xff] }
  0xaa   :  { %v948_v2 = vmul.f32 0.23388076, %v2015_v56  ;;  %v1423_v1 = vadd.f32 %v1279_v36, %v852_v50  ;;  %v1089_v53 = vmul.f32 0.2920817, %v698_v22  ;;  %v127_v6 = vmul.f32 0.120078385, %v79_v41 }
  0xab   :  { %v558_v33 = vadd.f32 %v510_v47, %v414_v30  ;;  %v2030_v12 = vmul.f32 0.120078385, %v2015_v56  ;;  %v1135_v35 = vadd.f32 %v1087_v4, %v1986_v31  ;;  %v1136_v13 = vadd.f32 %v1088_v51, %v1989_v54  ;;  %v176_v54 = vld [vmem:[#allocation3 + $0x201] sm:$0xff]  ;;  %v465_v32 = vld [vmem:[#allocation3 + $0x213] sm:$0xff] }
  0xac   :  { %v2035_v52 = vadd.f32 %v947_v43, %v2002_v42  ;;  %1471 = vst [vmem:[#allocation6 + $0x130] sm:$0xff] %v1423_v1  ;;  %v1377_v59 = vmul.f32 0.120078385, %v2024_v20  ;;  %v1137_v40 = vadd.f32 %v1089_v53, %v1996_v17  ;;  %v223_v22 = vmul.f32 0.23388076, %v175_v45  ;;  %v609_v62 = vld [vmem:[#allocation3 + $0x214] sm:$0xff] }
  0xad   :  { %v949_v21 = vmul.f32 0.23388076, %v2024_v20  ;;  %v2040_v24 = vadd.f32 %v654_v55, %v558_v33  ;;  %v1280_v58 = vadd.f32 %v1135_v35, %v946_v23  ;;  %v1281_v31 = vadd.f32 %v1136_v13, %v947_v43  ;;  %v177_v23 = vld [vmem:[#allocation3 + $0x211] sm:$0xff]  ;;  %v178_v45 = vld [vmem:[#allocation3 + $0x219] sm:$0xff] }
  0xae   :  { %v1282_v3 = vadd.f32 %v1137_v40, %v948_v2  ;;  %v271_v7 = vadd.f32 %v223_v22, %v127_v6  ;;  %v367_v42 = vmul.f32 0.2920817, %v319_v37  ;;  %v511_v49 = vmul.f32 0.23388076, %v463_v28  ;;  %v466_v33 = vld [vmem:[#allocation3 + $0x21b] sm:$0xff] }
  0xaf   :  { %v2043_v0 = vmul.f32 0.23388076, %v2040_v24  ;;  %v1424_v17 = vadd.f32 %v1280_v58, %v2030_v12  ;;  %v1425_v27 = vadd.f32 %v1377_v59, %v1281_v31  ;;  %v1378_v14 = vmul.f32 0.120078385, %v2040_v24 }
  0xb0   :  { %v415_v34 = vadd.f32 %v367_v42, %v271_v7  ;;  %v655_v63 = vmul.f32 0.120078385, %v607_v9  ;;  %v1090_v16 = vmul.f32 0.2920817, %v2009_v29  ;;  %v128_v5 = vmul.f32 0.120078385, %v80_v15 }
  0xb1   :  { %v996_v60 = vadd.f32 %v948_v2, %v2011_v8  ;;  %1472 = vst [vmem:[#allocation6 + $0x138] sm:$0xff] %v1424_v17  ;;  %v1426_v11 = vadd.f32 %v1378_v14, %v1282_v3  ;;  %v224_v18 = vmul.f32 0.23388076, %v176_v54  ;;  %v368_v48 = vmul.f32 0.2920817, %v320_v26  ;;  %v82_v8 = vld [vmem:[#allocation3 + $0x218] sm:$0xff] }
  0xb2   :  { %1473 = vst [vmem:[#allocation6 + $0x140] sm:$0xff] %v1425_v27  ;;  %v559_v19 = vadd.f32 %v511_v49, %v415_v34  ;;  %v1138_v46 = vadd.f32 %v1090_v16, %v2005_v57  ;;  %v512_v43 = vmul.f32 0.23388076, %v464_v44  ;;  %v656_v38 = vmul.f32 0.120078385, %v608_v10  ;;  %v322_v2 = vld [vmem:[#allocation3 + $0x21a] sm:$0xff] }
  0xb3   :  { %v2050_v47 = vadd.f32 %v949_v21, %v852_v50  ;;  %1474 = vst [vmem:[#allocation6 + $0x148] sm:$0xff] %v1426_v11  ;;  %v272_v41 = vadd.f32 %v224_v18, %v128_v5  ;;  %v1091_v29 = vmul.f32 0.2920817, %v2015_v56  ;;  %v129_v36 = vmul.f32 0.120078385, %v81_v25  ;;  %v610_v50 = vld [vmem:[#allocation3 + $0x21c] sm:$0xff] }
  0xb4   :  { %v703_v55 = vadd.f32 %v655_v63, %v559_v19  ;;  %v1283_v30 = vadd.f32 %v1138_v46, %v949_v21  ;;  %v225_v4 = vmul.f32 0.23388076, %v177_v23  ;;  %v369_v51 = vmul.f32 0.2920817, %v321_v61  ;;  %v83_v15 = vld [vmem:[#allocation3 + $0x228] sm:$0xff]  ;;  %v84_v5 = vld [vmem:[#allocation3 + $0x230] sm:$0xff] }
  0xb5   :  { %v416_v1 = vadd.f32 %v368_v48, %v272_v41  ;;  %v1139_v57 = vadd.f32 %v1091_v29, %v2021_v39  ;;  %v513_v53 = vmul.f32 0.23388076, %v465_v32  ;;  %v657_v6 = vmul.f32 0.120078385, %v609_v62  ;;  %v179_v9 = vld [vmem:[#allocation3 + $0x229] sm:$0xff]  ;;  %v180_v11 = vld [vmem:[#allocation3 + $0x231] sm:$0xff] }
  0xb6   :  { %v1379_v35 = vmul.f32 0.120078385, %v703_v55  ;;  %v273_v13 = vadd.f32 %v225_v4, %v129_v36  ;;  %v1092_v37 = vmul.f32 0.2920817, %v2024_v20  ;;  %v1237_v56 = vmul.f32 0.23388076, %v703_v55 }
  0xb7   :  { %v560_v28 = vadd.f32 %v512_v43, %v416_v1  ;;  %v1284_v59 = vadd.f32 %v1139_v57, %v2043_v0  ;;  %v130_v40 = vmul.f32 0.120078385, %v82_v8  ;;  %v226_v22 = vmul.f32 0.23388076, %v178_v45  ;;  %v323_v42 = vld [vmem:[#allocation3 + $0x22a] sm:$0xff]  ;;  %v324_v46 = vld [vmem:[#allocation3 + $0x232] sm:$0xff] }
  0xb8   :  { %v1427_v21 = vadd.f32 %v1379_v35, %v1283_v30  ;;  %v417_v58 = vadd.f32 %v369_v51, %v273_v13  ;;  %v1140_v31 = vadd.f32 %v1092_v37, %v2035_v52  ;;  %v370_v39 = vmul.f32 0.2920817, %v322_v2  ;;  %v467_v49 = vld [vmem:[#allocation3 + $0x22b] sm:$0xff]  ;;  %v468_v43 = vld [vmem:[#allocation3 + $0x233] sm:$0xff] }
  0xb9   :  { %v704_v54 = vadd.f32 %v656_v38, %v560_v28  ;;  %v274_v26 = vadd.f32 %v226_v22, %v130_v40  ;;  %v514_v3 = vmul.f32 0.23388076, %v466_v33  ;;  %v658_v7 = vmul.f32 0.120078385, %v610_v50  ;;  %v611_v27 = vld [vmem:[#allocation3 + $0x22c] sm:$0xff] }
  0xba   :  { %1475 = vst [vmem:[#allocation6 + $0x150] sm:$0xff] %v1427_v21  ;;  %v561_v20 = vadd.f32 %v513_v53, %v417_v58  ;;  %v1285_v44 = vadd.f32 %v1237_v56, %v1140_v31  ;;  %v1093_v25 = vmul.f32 0.2920817, %v2040_v24  ;;  %v131_v17 = vmul.f32 0.120078385, %v83_v15 }
  0xbb   :  { %v1380_v14 = vmul.f32 0.120078385, %v704_v54  ;;  %v418_v10 = vadd.f32 %v370_v39, %v274_v26  ;;  %v1238_v23 = vmul.f32 0.23388076, %v704_v54  ;;  %v227_v61 = vmul.f32 0.23388076, %v179_v9 }
  0xbc   :  { %v705_v52 = vadd.f32 %v657_v6, %v561_v20  ;;  %v1141_v34 = vadd.f32 %v1093_v25, %v996_v60  ;;  %v371_v63 = vmul.f32 0.2920817, %v323_v42  ;;  %v515_v16 = vmul.f32 0.23388076, %v467_v49  ;;  %v612_v60 = vld [vmem:[#allocation3 + $0x234] sm:$0xff] }
  0xbd   :  { %v1428_v18 = vadd.f32 %v1380_v14, %v1284_v59  ;;  %v562_v48 = vadd.f32 %v514_v3, %v418_v10  ;;  %v275_v32 = vadd.f32 %v227_v61, %v131_v17  ;;  %v659_v19 = vmul.f32 0.120078385, %v611_v27 }
  0xbe   :  { %v1381_v38 = vmul.f32 0.120078385, %v705_v52  ;;  %v1286_v24 = vadd.f32 %v1238_v23, %v1141_v34  ;;  %v1094_v62 = vmul.f32 0.2920817, %v703_v55  ;;  %v1239_v41 = vmul.f32 0.23388076, %v705_v52 }
  0xbf   :  { %1476 = vst [vmem:[#allocation6 + $0x158] sm:$0xff] %v1428_v18  ;;  %v706_v29 = vadd.f32 %v658_v7, %v562_v48  ;;  %v419_v36 = vadd.f32 %v371_v63, %v275_v32  ;;  %v132_v8 = vmul.f32 0.120078385, %v84_v5  ;;  %v228_v30 = vmul.f32 0.23388076, %v180_v11 }
  0xc0   :  { %v998_v4 = vadd.f32 %v2043_v0, %v2030_v12  ;;  %v1429_v51 = vadd.f32 %v1381_v38, %v1285_v44  ;;  %v1142_v45 = vadd.f32 %v1094_v62, %v2050_v47  ;;  %v372_v2 = vmul.f32 0.2920817, %v324_v46 }
  0xc1   :  { %v1382_v1 = vmul.f32 0.120078385, %v706_v29  ;;  %v563_v57 = vadd.f32 %v515_v16, %v419_v36  ;;  %v276_v53 = vadd.f32 %v228_v30, %v132_v8  ;;  %v516_v6 = vmul.f32 0.23388076, %v468_v43 }
  0xc2   :  { %1477 = vst [vmem:[#allocation6 + $0x160] sm:$0xff] %v1429_v51  ;;  %v1287_v55 = vadd.f32 %v1239_v41, %v1142_v45  ;;  %v660_v33 = vmul.f32 0.120078385, %v612_v60  ;;  %v1095_v50 = vmul.f32 0.2920817, %v704_v54 }
  0xc3   :  { %v1430_v35 = vadd.f32 %v1382_v1, %v1286_v24  ;;  %v707_v13 = vadd.f32 %v659_v19, %v563_v57  ;;  %v420_v37 = vadd.f32 %v372_v2, %v276_v53  ;;  %v1240_v56 = vmul.f32 0.23388076, %v706_v29 }
  0xc4   :  { %v1143_v28 = vadd.f32 %v1095_v50, %v998_v4 }
  0xc5   :  { %1478 = vst [vmem:[#allocation6 + $0x168] sm:$0xff] %v1430_v35  ;;  %v1383_v59 = vmul.f32 0.120078385, %v707_v13  ;;  %v564_v12 = vadd.f32 %v516_v6, %v420_v37 }
  0xc6   :  { %v1288_v47 = vadd.f32 %v1240_v56, %v1143_v28 }
  0xc7   :  { %v1431_v0 = vadd.f32 %v1383_v59, %v1287_v55  ;;  %v708_v40 = vadd.f32 %v660_v33, %v564_v12 }
  0xc9   :  { %1479 = vst [vmem:[#allocation6 + $0x170] sm:$0xff] %v1431_v0  ;;  %v1384_v22 = vmul.f32 0.120078385, %v708_v40 }
  0xcb   :  { %v1432_v15 = vadd.f32 %v1384_v22, %v1288_v47 }
  0xcd   :  { %1480 = vst [vmem:[#allocation6 + $0x178] sm:$0xff] %v1432_v15 }
  0xce   :  { %1510 = dma.vmem_to_hbm [thread:$0]  %s1503_s13, 6144, %s1505_s16, [#allocation5], %s1574_s11, %s1574_s11, %s1575_s12  }
  0xcf   :  { %1571 = dma.done.wait [#allocation5], 6144  }
  0xd0   :  { %1572 = vsyncadd [#allocation5], 4294961152 }
  0xd1   :  { %1515 = vsyncpa [#allocation4], 1 }
  0xd2   :  { %1516 = vsyncpa [#allocation5], 1 }

</bundles_post_ra>
